<compile_context>
chip_gen: v7x
topology: tpu7x:2x2x1
jax: 0.10.0
libtpu: 0.0.40
codegen_flags: <defaults>
</compile_context>

<pallas_src>
import functools

import jax
import jax.numpy as jnp
import numpy as np
from jax import lax
from jax.experimental import pallas as pl
from jax.experimental.pallas import tpu as pltpu


def _sl(start, size, stride):
    return pl.ds(start, size) if stride == 1 else pl.ds(start, size, stride)


def _choose_tile_rows(HO, WO, Wp, Cp, K, stride, budget_bytes=10 * 1024 * 1024):
    """Pick output rows per grid step so per-step VMEM stays within budget."""
    def vmem_usage(th):
        th_in = (th - 1) * stride + K
        inp = 2 * th_in * Wp * Cp * 2          # double-buffered bf16 input tile
        yout = 2 * th * WO * Cp * 2            # double-buffered bf16 y tile
        patches = th * WO * K * K * Cp * 2     # concatenated bf16 patches (temp)
        acc = th * WO * Cp * 4                 # f32 matmul result
        w = K * K * Cp * Cp * 2                # resident folded weight
        return inp + yout + patches + acc + w

    th = max(1, HO)
    while th > 1 and vmem_usage(th) > budget_bytes:
        th = (th + 1) // 2
    return th


def _make_conv_kernel(K, stride, TH, WO, HO, Cp):
    def conv_kernel(x_ref, w_ref, y_ref, stats_ref):
        # x_ref: (TH_IN, Wp, Cp) bf16 row tile (includes the K-halo rows)
        # w_ref: (K*K*Cp, Cp) bf16 folded depthwise+pointwise weight
        # y_ref: (TH*WO, Cp) bf16 flattened output tile
        # stats_ref: (8, Cp) f32 -> row0 = partial sum, row1 = partial sum-of-squares
        t = pl.program_id(1)

        # Gather the K*K shifted (strided) patches and lay them side by side on
        # the lane axis.  Cp is a multiple of 128, so the concat is pure vreg
        # placement (no cross-lane shuffles).
        patches = []
        for ki in range(K):
            for kj in range(K):
                p = x_ref[_sl(ki, TH, stride), _sl(kj, WO, stride), :]
                patches.append(p.reshape(TH * WO, Cp))
        p2d = jnp.concatenate(patches, axis=-1)              # (TH*WO, K*K*Cp) bf16

        # Depthwise + pointwise fused into one MXU matmul (deep K*K*Cp
        # contraction), accumulated in f32.
        y2d = jnp.dot(p2d, w_ref[...], preferred_element_type=jnp.float32)

        y_ref[...] = y2d.astype(y_ref.dtype)

        # Per-tile partial BatchNorm statistics.  Rows past HO in the last
        # (ragged) tile are masked out.  Each grid step owns its own slot, so
        # both grid axes can stay "parallel" (v7x megacore friendly).
        valid = (HO - t * TH) * WO
        flat_ids = lax.broadcasted_iota(jnp.int32, (TH * WO, Cp), 0)
        ym = jnp.where(flat_ids < valid, y2d, 0.0)
        stats_ref[0:1, :] = jnp.sum(ym, axis=0, keepdims=True)
        stats_ref[1:2, :] = jnp.sum(ym * ym, axis=0, keepdims=True)
        stats_ref[2:8, :] = jnp.zeros((6, Cp), jnp.float32)

    return conv_kernel


def _bn_relu_kernel(y_ref, mean_ref, scale_ref, beta_ref, o_ref):
    y = y_ref[...].astype(jnp.float32)
    o_ref[...] = jnp.maximum((y - mean_ref[...]) * scale_ref[...] + beta_ref[...], 0.0)


def dwblock_forward(x_nchw, w_dw, w_pw, gamma, beta, *, kernel_size, stride,
                    eps=1e-5, tile_rows=None):
    """Pallas DWBlock forward. x: (N,C,H,W), w_dw: (C,1,K,K), w_pw: (C,C,1,1)."""
    N, C, H, W = x_nchw.shape
    K = kernel_size
    pad = K // 2
    HO = (H + 2 * pad - K) // stride + 1
    WO = (W + 2 * pad - K) // stride + 1
    Wp = W + 2 * pad

    # Lane-pad channels to a multiple of 128 (full vreg lanes, full MXU width).
    Cp = max(128, ((C + 127) // 128) * 128)

    # Row-tile size and grid extent.
    if tile_rows is None:
        TH = _choose_tile_rows(HO, WO, Wp, Cp, K, stride)
    else:
        TH = max(1, min(tile_rows, HO))
    T = -(-HO // TH)
    TH_IN = (TH - 1) * stride + K
    rows_needed = (T * TH - 1) * stride + K
    extra_bottom = max(0, rows_needed - (H + 2 * pad))

    # ---- wrapper glue (one fused XLA pass over the input): NCHW->NHWC,
    # zero-pad (spatial + channel), cast to bf16 and gather overlapping row
    # tiles with their K-halo so the kernel uses plain Blocked specs. ----
    x_nhwc = jnp.transpose(x_nchw, (0, 2, 3, 1))
    xp = jnp.pad(x_nhwc, ((0, 0), (pad, pad + extra_bottom), (pad, pad), (0, Cp - C)))
    xp = xp.astype(jnp.bfloat16)
    row_idx = jnp.arange(T)[:, None] * (TH * stride) + jnp.arange(TH_IN)[None, :]
    x_tiles = xp[:, row_idx]                                  # (N, T, TH_IN, Wp, Cp)

    # Fold the depthwise taps into the pointwise matmul:
    #   wfold[tap*Cp + ci, co] = w_dw[ci, tap] * w_pw[co, ci]
    wdw_p = jnp.zeros((Cp, K * K), jnp.float32).at[:C].set(
        w_dw.reshape(C, K * K).astype(jnp.float32))
    wpw_p = jnp.zeros((Cp, Cp), jnp.float32).at[:C, :C].set(
        jnp.transpose(w_pw.reshape(C, C)).astype(jnp.float32))
    wfold = (jnp.transpose(wdw_p)[:, :, None] * wpw_p[None, :, :])
    wfold = wfold.reshape(K * K * Cp, Cp).astype(jnp.bfloat16)

    cparams = pltpu.CompilerParams(
        dimension_semantics=("parallel", "parallel"),
        vmem_limit_bytes=32 * 1024 * 1024)

    # ---- kernel A: fused depthwise+pointwise conv + partial BN stats ----
    conv_kernel = _make_conv_kernel(K, stride, TH, WO, HO, Cp)
    y, stats = pl.pallas_call(
        conv_kernel,
        out_shape=(
            jax.ShapeDtypeStruct((N, T, TH * WO, Cp), jnp.bfloat16),
            jax.ShapeDtypeStruct((N, T, 8, Cp), jnp.float32),
        ),
        grid_spec=pltpu.PrefetchScalarGridSpec(
            num_scalar_prefetch=0,
            grid=(N, T),
            in_specs=[
                pl.BlockSpec((None, None, TH_IN, Wp, Cp), lambda n, t: (n, t, 0, 0, 0)),
                pl.BlockSpec((K * K * Cp, Cp), lambda n, t: (0, 0)),
            ],
            out_specs=[
                pl.BlockSpec((None, None, TH * WO, Cp), lambda n, t: (n, t, 0, 0)),
                pl.BlockSpec((None, None, 8, Cp), lambda n, t: (n, t, 0, 0)),
            ],
        ),
        compiler_params=cparams,
    )(x_tiles, wfold)

    # ---- BN statistics (tiny per-channel math in plain JAX glue) ----
    # Note: var = E[y^2] - E[y]^2 in f32; clamp tiny negative values from
    # cancellation (exact zeros for the padded channels).
    count = jnp.float32(N * HO * WO)
    psum = jnp.sum(stats[:, :, 0, :], axis=(0, 1))
    pssq = jnp.sum(stats[:, :, 1, :], axis=(0, 1))
    mean = psum / count
    var = jnp.maximum(pssq / count - mean * mean, 0.0)        # biased (train-mode BN)
    gamma_p = jnp.zeros((Cp,), jnp.float32).at[:C].set(gamma.astype(jnp.float32))
    beta_p = jnp.zeros((Cp,), jnp.float32).at[:C].set(beta.astype(jnp.float32))
    scale = gamma_p / jnp.sqrt(var + eps)

    # ---- kernel B: BN apply + ReLU on the flat bf16 intermediate ----
    out_flat = pl.pallas_call(
        _bn_relu_kernel,
        out_shape=jax.ShapeDtypeStruct((N, T, TH * WO, Cp), jnp.float32),
        grid_spec=pltpu.PrefetchScalarGridSpec(
            num_scalar_prefetch=0,
            grid=(N, T),
            in_specs=[
                pl.BlockSpec((None, None, TH * WO, Cp), lambda n, t: (n, t, 0, 0)),
                pl.BlockSpec((1, Cp), lambda n, t: (0, 0)),
                pl.BlockSpec((1, Cp), lambda n, t: (0, 0)),
                pl.BlockSpec((1, Cp), lambda n, t: (0, 0)),
            ],
            out_specs=pl.BlockSpec((None, None, TH * WO, Cp), lambda n, t: (n, t, 0, 0)),
        ),
        compiler_params=cparams,
    )(y, mean.reshape(1, Cp), scale.reshape(1, Cp), beta_p.reshape(1, Cp))

    out = out_flat.reshape(N, T * TH, WO, Cp)[:, :HO, :, :C]
    return jnp.transpose(out, (0, 3, 1, 2))                   # back to NCHW


def dwblock_reference(x_nchw, w_dw, w_pw, gamma, beta, *, kernel_size, stride, eps=1e-5):
    """Pure-JAX f32 reference matching PyTorch semantics (training-mode BatchNorm)."""
    C = x_nchw.shape[1]
    pad = kernel_size // 2
    dn = lax.conv_dimension_numbers(x_nchw.shape, w_dw.shape, ("NCHW", "OIHW", "NCHW"))
    y = lax.conv_general_dilated(
        x_nchw, w_dw, window_strides=(stride, stride),
        padding=((pad, pad), (pad, pad)), dimension_numbers=dn,
        feature_group_count=C)
    y = lax.conv_general_dilated(
        y, w_pw, window_strides=(1, 1), padding=((0, 0), (0, 0)),
        dimension_numbers=dn)
    mean = jnp.mean(y, axis=(0, 2, 3), keepdims=True)
    var = jnp.mean((y - mean) ** 2, axis=(0, 2, 3), keepdims=True)
    yhat = (y - mean) / jnp.sqrt(var + eps)
    yhat = yhat * gamma.reshape(1, C, 1, 1) + beta.reshape(1, C, 1, 1)
    return jnp.maximum(yhat, 0.0)


if __name__ == "__main__":
    # Small shapes consistent with DWBlock (in_channels == out_channels required
    # by groups=out_channels), kernel_size=3, stride=1.
    N, C, H, W = 2, 8, 16, 16
    K, STRIDE = 3, 1

    key = jax.random.PRNGKey(0)
    k_x, k_dw, k_pw = jax.random.split(key, 3)
    x = jax.random.normal(k_x, (N, C, H, W), dtype=jnp.float32)
    w_dw = jax.random.normal(k_dw, (C, 1, K, K), dtype=jnp.float32) * 0.2
    w_pw = jax.random.normal(k_pw, (C, C, 1, 1), dtype=jnp.float32) * 0.2
    gamma = jnp.ones((C,), dtype=jnp.float32)   # BatchNorm2d default init
    beta = jnp.zeros((C,), dtype=jnp.float32)

    # tile_rows=6 does not divide HO=16 -> exercises multi-tile grid + ragged
    # last-tile masking of the BN statistics.
    fwd = jax.jit(functools.partial(dwblock_forward, kernel_size=K, stride=STRIDE,
                                    tile_rows=6))
    out = jax.block_until_ready(fwd(x, w_dw, w_pw, gamma, beta))

    ref = dwblock_reference(x, w_dw, w_pw, gamma, beta, kernel_size=K, stride=STRIDE)
    # Tolerance reflects the deliberate bf16 MXU path (f32 accumulation) and the
    # bf16 intermediate between the conv and BN/ReLU kernels.
    np.testing.assert_allclose(np.asarray(out), np.asarray(ref), rtol=3e-2, atol=3e-2)

    print("KERNEL_OK")
</pallas_src>

<mosaic_0001>
module attributes {stable_mosaic.version = 11 : i64} {
  func.func @conv_kernel(%arg0: i32, %arg1: i32, %arg2: memref<1x1x8x18x128xbf16, #tpu.memory_space<vmem>>, %arg3: memref<1152x128xbf16, #tpu.memory_space<vmem>>, %arg4: memref<1x1x96x128xbf16, #tpu.memory_space<vmem>>, %arg5: memref<1x1x8x128xf32, #tpu.memory_space<vmem>>) attributes {dimension_semantics = [#tpu.dimension_semantics<parallel>, #tpu.dimension_semantics<parallel>], iteration_bounds = array<i64: 2, 3>, scalar_prefetch = 0 : i64, scratch_operands = 0 : i64, tpu.core_type = #tpu.core_type<tc>, window_params = [{transform_indices = @transform_0, window_bounds = array<i64: 1, 1, 8, 18, 128>}, {pipeline_mode = #tpu.pipeline_mode<synchronous>, transform_indices = @transform_1, window_bounds = array<i64: 1152, 128>}, {transform_indices = @transform_2, window_bounds = array<i64: 1, 1, 96, 128>}, {transform_indices = @transform_3, window_bounds = array<i64: 1, 1, 8, 128>}]} {
    %c0 = arith.constant 0 : index
    %c0_0 = arith.constant 0 : index
    %c0_1 = arith.constant 0 : index
    %c0_2 = arith.constant 0 : index
    %c0_3 = arith.constant 0 : index
    %0 = vector.load %arg2[%c0, %c0_0, %c0_1, %c0_2, %c0_3] : memref<1x1x8x18x128xbf16, #tpu.memory_space<vmem>>, vector<1x1x6x16x128xbf16>
    %1 = vector.shape_cast %0 : vector<1x1x6x16x128xbf16> to vector<6x16x128xbf16>
    %2 = vector.shape_cast %1 : vector<6x16x128xbf16> to vector<96x128xbf16>
    %c0_4 = arith.constant 0 : index
    %c0_5 = arith.constant 0 : index
    %c0_6 = arith.constant 0 : index
    %c1 = arith.constant 1 : index
    %c0_7 = arith.constant 0 : index
    %3 = vector.load %arg2[%c0_4, %c0_5, %c0_6, %c1, %c0_7] : memref<1x1x8x18x128xbf16, #tpu.memory_space<vmem>>, vector<1x1x6x16x128xbf16>
    %4 = vector.shape_cast %3 : vector<1x1x6x16x128xbf16> to vector<6x16x128xbf16>
    %5 = vector.shape_cast %4 : vector<6x16x128xbf16> to vector<96x128xbf16>
    %c0_8 = arith.constant 0 : index
    %c0_9 = arith.constant 0 : index
    %c0_10 = arith.constant 0 : index
    %c2 = arith.constant 2 : index
    %c0_11 = arith.constant 0 : index
    %6 = vector.load %arg2[%c0_8, %c0_9, %c0_10, %c2, %c0_11] : memref<1x1x8x18x128xbf16, #tpu.memory_space<vmem>>, vector<1x1x6x16x128xbf16>
    %7 = vector.shape_cast %6 : vector<1x1x6x16x128xbf16> to vector<6x16x128xbf16>
    %8 = vector.shape_cast %7 : vector<6x16x128xbf16> to vector<96x128xbf16>
    %c0_12 = arith.constant 0 : index
    %c0_13 = arith.constant 0 : index
    %c1_14 = arith.constant 1 : index
    %c0_15 = arith.constant 0 : index
    %c0_16 = arith.constant 0 : index
    %9 = vector.load %arg2[%c0_12, %c0_13, %c1_14, %c0_15, %c0_16] : memref<1x1x8x18x128xbf16, #tpu.memory_space<vmem>>, vector<1x1x6x16x128xbf16>
    %10 = vector.shape_cast %9 : vector<1x1x6x16x128xbf16> to vector<6x16x128xbf16>
    %11 = vector.shape_cast %10 : vector<6x16x128xbf16> to vector<96x128xbf16>
    %c0_17 = arith.constant 0 : index
    %c0_18 = arith.constant 0 : index
    %c1_19 = arith.constant 1 : index
    %c1_20 = arith.constant 1 : index
    %c0_21 = arith.constant 0 : index
    %12 = vector.load %arg2[%c0_17, %c0_18, %c1_19, %c1_20, %c0_21] : memref<1x1x8x18x128xbf16, #tpu.memory_space<vmem>>, vector<1x1x6x16x128xbf16>
    %13 = vector.shape_cast %12 : vector<1x1x6x16x128xbf16> to vector<6x16x128xbf16>
    %14 = vector.shape_cast %13 : vector<6x16x128xbf16> to vector<96x128xbf16>
    %c0_22 = arith.constant 0 : index
    %c0_23 = arith.constant 0 : index
    %c1_24 = arith.constant 1 : index
    %c2_25 = arith.constant 2 : index
    %c0_26 = arith.constant 0 : index
    %15 = vector.load %arg2[%c0_22, %c0_23, %c1_24, %c2_25, %c0_26] : memref<1x1x8x18x128xbf16, #tpu.memory_space<vmem>>, vector<1x1x6x16x128xbf16>
    %16 = vector.shape_cast %15 : vector<1x1x6x16x128xbf16> to vector<6x16x128xbf16>
    %17 = vector.shape_cast %16 : vector<6x16x128xbf16> to vector<96x128xbf16>
    %c0_27 = arith.constant 0 : index
    %c0_28 = arith.constant 0 : index
    %c2_29 = arith.constant 2 : index
    %c0_30 = arith.constant 0 : index
    %c0_31 = arith.constant 0 : index
    %18 = vector.load %arg2[%c0_27, %c0_28, %c2_29, %c0_30, %c0_31] : memref<1x1x8x18x128xbf16, #tpu.memory_space<vmem>>, vector<1x1x6x16x128xbf16>
    %19 = vector.shape_cast %18 : vector<1x1x6x16x128xbf16> to vector<6x16x128xbf16>
    %20 = vector.shape_cast %19 : vector<6x16x128xbf16> to vector<96x128xbf16>
    %c0_32 = arith.constant 0 : index
    %c0_33 = arith.constant 0 : index
    %c2_34 = arith.constant 2 : index
    %c1_35 = arith.constant 1 : index
    %c0_36 = arith.constant 0 : index
    %21 = vector.load %arg2[%c0_32, %c0_33, %c2_34, %c1_35, %c0_36] : memref<1x1x8x18x128xbf16, #tpu.memory_space<vmem>>, vector<1x1x6x16x128xbf16>
    %22 = vector.shape_cast %21 : vector<1x1x6x16x128xbf16> to vector<6x16x128xbf16>
    %23 = vector.shape_cast %22 : vector<6x16x128xbf16> to vector<96x128xbf16>
    %c0_37 = arith.constant 0 : index
    %c0_38 = arith.constant 0 : index
    %c2_39 = arith.constant 2 : index
    %c2_40 = arith.constant 2 : index
    %c0_41 = arith.constant 0 : index
    %24 = vector.load %arg2[%c0_37, %c0_38, %c2_39, %c2_40, %c0_41] : memref<1x1x8x18x128xbf16, #tpu.memory_space<vmem>>, vector<1x1x6x16x128xbf16>
    %25 = vector.shape_cast %24 : vector<1x1x6x16x128xbf16> to vector<6x16x128xbf16>
    %26 = vector.shape_cast %25 : vector<6x16x128xbf16> to vector<96x128xbf16>
    %27 = tpu.concatenate %2, %5, %8, %11, %14, %17, %20, %23, %26 in 1 : vector<96x128xbf16>, vector<96x128xbf16>, vector<96x128xbf16>, vector<96x128xbf16>, vector<96x128xbf16>, vector<96x128xbf16>, vector<96x128xbf16>, vector<96x128xbf16>, vector<96x128xbf16> -> vector<96x1152xbf16>
    %c0_42 = arith.constant 0 : index
    %c0_43 = arith.constant 0 : index
    %28 = vector.load %arg3[%c0_42, %c0_43] : memref<1152x128xbf16, #tpu.memory_space<vmem>>, vector<1152x128xbf16>
    %cst = arith.constant dense<0.000000e+00> : vector<96x128xf32>
    %29 = tpu.matmul %27, %28, %cst {dimension_numbers = #tpu.dot_dimension_numbers<[1], [0], [0], [1], [0, 0, 1, 1], [], []>} : vector<96x1152xbf16>, vector<1152x128xbf16>, vector<96x128xf32> -> vector<96x128xf32>
    %30 = arith.truncf %29 : vector<96x128xf32> to vector<96x128xbf16>
    %c0_44 = arith.constant 0 : index
    %c0_45 = arith.constant 0 : index
    %c0_46 = arith.constant 0 : index
    %c0_47 = arith.constant 0 : index
    %31 = vector.load %arg4[%c0_44, %c0_45, %c0_46, %c0_47] : memref<1x1x96x128xbf16, #tpu.memory_space<vmem>>, vector<1x1x96x128xbf16>
    %32 = vector.shape_cast %31 : vector<1x1x96x128xbf16> to vector<96x128xbf16>
    %33 = vector.shape_cast %30 : vector<96x128xbf16> to vector<1x1x96x128xbf16>
    tpu.vector_store %arg4[%c0_44, %c0_45, %c0_46, %c0_47], %33 {strides = array<i32>} : memref<1x1x96x128xbf16, #tpu.memory_space<vmem>>, vector<1x1x96x128xbf16>,
    %c6_i32 = arith.constant 6 : i32
    %34 = arith.muli %arg1, %c6_i32 : i32
    %c16_i32 = arith.constant 16 : i32
    %35 = arith.subi %c16_i32, %34 : i32
    %c16_i32_48 = arith.constant 16 : i32
    %36 = arith.muli %35, %c16_i32_48 : i32
    %37 = tpu.iota {dimensions = array<i32: 0>} : vector<96x128xi32>
    %38 = vector.broadcast %36 : i32 to vector<96x128xi32>
    %39 = arith.cmpi slt, %37, %38 : vector<96x128xi32>
    %cst_49 = arith.constant 0.000000e+00 : f32
    %40 = vector.broadcast %cst_49 : f32 to vector<96x128xf32>
    %41 = arith.select %39, %29, %40 : vector<96x128xi1>, vector<96x128xf32>
    %cst_50 = arith.constant dense<0.000000e+00> : vector<128xf32>
    %42 = vector.multi_reduction <add>, %41, %cst_50 [0] : vector<96x128xf32> to vector<128xf32>
    %43 = vector.shape_cast %42 : vector<128xf32> to vector<1x128xf32>
    %c0_51 = arith.constant 0 : index
    %c0_52 = arith.constant 0 : index
    %c0_53 = arith.constant 0 : index
    %c0_54 = arith.constant 0 : index
    %44 = vector.load %arg5[%c0_51, %c0_52, %c0_53, %c0_54] : memref<1x1x8x128xf32, #tpu.memory_space<vmem>>, vector<1x1x1x128xf32>
    %45 = vector.shape_cast %44 : vector<1x1x1x128xf32> to vector<1x128xf32>
    %46 = vector.shape_cast %43 : vector<1x128xf32> to vector<1x1x1x128xf32>
    tpu.vector_store %arg5[%c0_51, %c0_52, %c0_53, %c0_54], %46 {strides = array<i32>} : memref<1x1x8x128xf32, #tpu.memory_space<vmem>>, vector<1x1x1x128xf32>,
    %47 = arith.mulf %41, %41 : vector<96x128xf32>
    %cst_55 = arith.constant dense<0.000000e+00> : vector<128xf32>
    %48 = vector.multi_reduction <add>, %47, %cst_55 [0] : vector<96x128xf32> to vector<128xf32>
    %49 = vector.shape_cast %48 : vector<128xf32> to vector<1x128xf32>
    %c0_56 = arith.constant 0 : index
    %c0_57 = arith.constant 0 : index
    %c1_58 = arith.constant 1 : index
    %c0_59 = arith.constant 0 : index
    %50 = vector.load %arg5[%c0_56, %c0_57, %c1_58, %c0_59] : memref<1x1x8x128xf32, #tpu.memory_space<vmem>>, vector<1x1x1x128xf32>
    %51 = vector.shape_cast %50 : vector<1x1x1x128xf32> to vector<1x128xf32>
    %52 = vector.shape_cast %49 : vector<1x128xf32> to vector<1x1x1x128xf32>
    tpu.vector_store %arg5[%c0_56, %c0_57, %c1_58, %c0_59], %52 {strides = array<i32>} : memref<1x1x8x128xf32, #tpu.memory_space<vmem>>, vector<1x1x1x128xf32>,
    %cst_60 = arith.constant 0.000000e+00 : f32
    %53 = vector.broadcast %cst_60 : f32 to vector<6x128xf32>
    %c0_61 = arith.constant 0 : index
    %c0_62 = arith.constant 0 : index
    %c2_63 = arith.constant 2 : index
    %c0_64 = arith.constant 0 : index
    %54 = vector.load %arg5[%c0_61, %c0_62, %c2_63, %c0_64] : memref<1x1x8x128xf32, #tpu.memory_space<vmem>>, vector<1x1x6x128xf32>
    %55 = vector.shape_cast %54 : vector<1x1x6x128xf32> to vector<6x128xf32>
    %56 = vector.shape_cast %53 : vector<6x128xf32> to vector<1x1x6x128xf32>
    tpu.vector_store %arg5[%c0_61, %c0_62, %c2_63, %c0_64], %56 {strides = array<i32>} : memref<1x1x8x128xf32, #tpu.memory_space<vmem>>, vector<1x1x6x128xf32>,
    return
  }
  func.func @transform_0(%arg0: i32, %arg1: i32) -> (i32, i32, i32, i32, i32) {
    %c0_i32 = arith.constant 0 : i32
    %c0_i32_0 = arith.constant 0 : i32
    %c0_i32_1 = arith.constant 0 : i32
    %c0_i32_2 = arith.constant 0 : i32
    return %arg0, %arg1, %c0_i32, %c0_i32_0, %c0_i32_1 : i32, i32, i32, i32, i32
  }
  func.func @transform_1(%arg0: i32, %arg1: i32) -> (i32, i32) {
    %c0_i32 = arith.constant 0 : i32
    %c0_i32_0 = arith.constant 0 : i32
    %c0_i32_1 = arith.constant 0 : i32
    return %c0_i32, %c0_i32_0 : i32, i32
  }
  func.func @transform_2(%arg0: i32, %arg1: i32) -> (i32, i32, i32, i32) {
    %c0_i32 = arith.constant 0 : i32
    %c0_i32_0 = arith.constant 0 : i32
    %c0_i32_1 = arith.constant 0 : i32
    return %arg0, %arg1, %c0_i32, %c0_i32_0 : i32, i32, i32, i32
  }
  func.func @transform_3(%arg0: i32, %arg1: i32) -> (i32, i32, i32, i32) {
    %c0_i32 = arith.constant 0 : i32
    %c0_i32_0 = arith.constant 0 : i32
    %c0_i32_1 = arith.constant 0 : i32
    return %arg0, %arg1, %c0_i32, %c0_i32_0 : i32, i32, i32, i32
  }
}

module attributes {stable_mosaic.version = 11 : i64} {
  func.func @_bn_relu_kernel(%arg0: i32, %arg1: i32, %arg2: memref<1x1x96x128xbf16, #tpu.memory_space<vmem>>, %arg3: memref<1x128xf32, #tpu.memory_space<vmem>>, %arg4: memref<1x128xf32, #tpu.memory_space<vmem>>, %arg5: memref<1x128xf32, #tpu.memory_space<vmem>>, %arg6: memref<1x1x96x128xf32, #tpu.memory_space<vmem>>) attributes {dimension_semantics = [#tpu.dimension_semantics<parallel>, #tpu.dimension_semantics<parallel>], iteration_bounds = array<i64: 2, 3>, scalar_prefetch = 0 : i64, scratch_operands = 0 : i64, tpu.core_type = #tpu.core_type<tc>, window_params = [{transform_indices = @transform_0, window_bounds = array<i64: 1, 1, 96, 128>}, {pipeline_mode = #tpu.pipeline_mode<synchronous>, transform_indices = @transform_1, window_bounds = array<i64: 1, 128>}, {pipeline_mode = #tpu.pipeline_mode<synchronous>, transform_indices = @transform_2, window_bounds = array<i64: 1, 128>}, {pipeline_mode = #tpu.pipeline_mode<synchronous>, transform_indices = @transform_3, window_bounds = array<i64: 1, 128>}, {transform_indices = @transform_4, window_bounds = array<i64: 1, 1, 96, 128>}]} {
    %c0 = arith.constant 0 : index
    %c0_0 = arith.constant 0 : index
    %c0_1 = arith.constant 0 : index
    %c0_2 = arith.constant 0 : index
    %0 = vector.load %arg2[%c0, %c0_0, %c0_1, %c0_2] : memref<1x1x96x128xbf16, #tpu.memory_space<vmem>>, vector<1x1x96x128xbf16>
    %1 = vector.shape_cast %0 : vector<1x1x96x128xbf16> to vector<96x128xbf16>
    %2 = arith.extf %1 : vector<96x128xbf16> to vector<96x128xf32>
    %c0_3 = arith.constant 0 : index
    %c0_4 = arith.constant 0 : index
    %3 = vector.load %arg3[%c0_3, %c0_4] : memref<1x128xf32, #tpu.memory_space<vmem>>, vector<1x128xf32>
    %4 = vector.broadcast %3 : vector<1x128xf32> to vector<96x128xf32>
    %5 = arith.subf %2, %4 : vector<96x128xf32>
    %c0_5 = arith.constant 0 : index
    %c0_6 = arith.constant 0 : index
    %6 = vector.load %arg4[%c0_5, %c0_6] : memref<1x128xf32, #tpu.memory_space<vmem>>, vector<1x128xf32>
    %7 = vector.broadcast %6 : vector<1x128xf32> to vector<96x128xf32>
    %8 = arith.mulf %5, %7 : vector<96x128xf32>
    %c0_7 = arith.constant 0 : index
    %c0_8 = arith.constant 0 : index
    %9 = vector.load %arg5[%c0_7, %c0_8] : memref<1x128xf32, #tpu.memory_space<vmem>>, vector<1x128xf32>
    %10 = vector.broadcast %9 : vector<1x128xf32> to vector<96x128xf32>
    %11 = arith.addf %8, %10 : vector<96x128xf32>
    %cst = arith.constant 0.000000e+00 : f32
    %12 = vector.broadcast %cst : f32 to vector<96x128xf32>
    %13 = arith.maximumf %11, %12 : vector<96x128xf32>
    %c0_9 = arith.constant 0 : index
    %c0_10 = arith.constant 0 : index
    %c0_11 = arith.constant 0 : index
    %c0_12 = arith.constant 0 : index
    %14 = vector.load %arg6[%c0_9, %c0_10, %c0_11, %c0_12] : memref<1x1x96x128xf32, #tpu.memory_space<vmem>>, vector<1x1x96x128xf32>
    %15 = vector.shape_cast %14 : vector<1x1x96x128xf32> to vector<96x128xf32>
    %16 = vector.shape_cast %13 : vector<96x128xf32> to vector<1x1x96x128xf32>
    tpu.vector_store %arg6[%c0_9, %c0_10, %c0_11, %c0_12], %16 {strides = array<i32>} : memref<1x1x96x128xf32, #tpu.memory_space<vmem>>, vector<1x1x96x128xf32>,
    return
  }
  func.func @transform_0(%arg0: i32, %arg1: i32) -> (i32, i32, i32, i32) {
    %c0_i32 = arith.constant 0 : i32
    %c0_i32_0 = arith.constant 0 : i32
    %c0_i32_1 = arith.constant 0 : i32
    return %arg0, %arg1, %c0_i32, %c0_i32_0 : i32, i32, i32, i32
  }
  func.func @transform_1(%arg0: i32, %arg1: i32) -> (i32, i32) {
    %c0_i32 = arith.constant 0 : i32
    %c0_i32_0 = arith.constant 0 : i32
    %c0_i32_1 = arith.constant 0 : i32
    return %c0_i32, %c0_i32_0 : i32, i32
  }
  func.func @transform_2(%arg0: i32, %arg1: i32) -> (i32, i32) {
    %c0_i32 = arith.constant 0 : i32
    %c0_i32_0 = arith.constant 0 : i32
    %c0_i32_1 = arith.constant 0 : i32
    return %c0_i32, %c0_i32_0 : i32, i32
  }
  func.func @transform_3(%arg0: i32, %arg1: i32) -> (i32, i32) {
    %c0_i32 = arith.constant 0 : i32
    %c0_i32_0 = arith.constant 0 : i32
    %c0_i32_1 = arith.constant 0 : i32
    return %c0_i32, %c0_i32_0 : i32, i32
  }
  func.func @transform_4(%arg0: i32, %arg1: i32) -> (i32, i32, i32, i32) {
    %c0_i32 = arith.constant 0 : i32
    %c0_i32_0 = arith.constant 0 : i32
    %c0_i32_1 = arith.constant 0 : i32
    return %arg0, %arg1, %c0_i32, %c0_i32_0 : i32, i32, i32, i32
  }
}

</mosaic_0001>

<bundles_post_ra>
// kernel: dwblock_forward.3
= control target key start
LH: loop header
LB: loop body
LE: loop exit
PB: predicated region body
PF: predicated region fallthrough
CT: control target
= control target key end

     0   :  { %s582_s15 = smov 0   ;;  %s584_s16 = smov 0   ;;  %s682_s0 = inlined_call_operand.vmem [shape: bf16[2,3,96,128], index: 0, kind: input, shape index: {}]   ;;  %s683_s1 = inlined_call_operand.vmem [shape: f32[1,128], index: 1, kind: input, shape index: {}]   ;;  %s684_s2 = inlined_call_operand.vmem [shape: f32[1,128], index: 2, kind: input, shape index: {}]   ;;  %s685_s3 = inlined_call_operand.vmem [shape: f32[1,128], index: 3, kind: input, shape index: {}]   ;;  %s686_s4 = inlined_call_operand.vmem [shape: f32[2,3,96,128], index: 4, kind: output, shape index: {}]  }
   0x1   :  { %s586_s17 = smov 0   ;;  %s588_s18 = smov 0  }
   0x2   :  { %s590_s19 = smov 0  }
   0x3 LB: > { %s23_s20 = sadd.s32 1, %s547_s17  ;;  %s26_s21 = sadd.s32 1, %s551_s18  ;;  %s555_s19 = sphi %s590_s19, %s14_s19   ;;  %s551_s18 = sphi %s588_s18, %s690_s18   ;;  %s547_s17 = sphi %s586_s17, %s689_s17   ;;  %s543_s16 = sphi %s584_s16, %s688_s16   ;;  %s539_s15 = sphi %s582_s15, %s687_s15  }
   0x4   : > { %p24_p0 = scmp.ge.s32.totalorder %s23_s20, 3  ;;  %p438_p1 = scmp.ge.s32.totalorder %s555_s19, 1 }
   0x5   : > { %p182_p2 = scmp.lt.s32.totalorder %s555_s19, 7 }
   0x6   : > { %s692_s20 = smov (%p24_p0, %s23_s20), 0  ;;  %s694_s21 = smov (!%p24_p0, %s26_s21), %s551_s18 }
   0x7   : > { %p183_p3 = pnand %p438_p1, %p182_p2  ;;  %p28_p4 = scmp.ge.s32.totalorder %s694_s21, 2 }
   0x8   : > { %p216_p5 = scmp.lt.s32.totalorder (!%p183_p3), %s543_s16, 1  ;;  %p218_p6 = scmp.lt.s32.totalorder (!%p183_p3), %s539_s15, 2  ;;  %v623_v0 = vld [vmem:[%s683_s1] ss:$0 sm:$0xff] (!%p183_p3) }
   0x9   : > { %s696_s21 = smov (%p28_p4, %s694_s21), 0  ;;  %186 = sbr.rel (%p183_p3) target bundleno = 46 (0x2e), region = 36 }
   0xa   : > { %v442_v9 = vld [vmem:[%s684_s2] ss:$0 sm:$0xff] (!%p183_p3) }
   0xb   : > { %v443_v18 = vld [vmem:[%s685_s3] ss:$0 sm:$0xff] (!%p183_p3) }
  0x10   : > { %s698_s16 = smov (!%p216_p5, %s543_s16), 1  ;;  %s700_s15 = smov (!%p218_p6, %s539_s15), 2 }
  0x11   : > { %s476_s22 = smul.u32 36, %s698_s16 }
  0x12   : > { %s475_s23 = smul.u32 12, %s700_s15 }
  0x14   : > { %s612_s24 = sadd.s32 %s476_s22, %s475_s23 }
  0x15   : > { %s439_s25 = sshll.u32 %s612_s24, 2  ;;  %s440_s9 = sshll.u32 %s612_s24, 3 }
  0x16   : > { %s618_s28 = scalar_lea.vmem %s682_s0, %s439_s25  ;;  %s647_s12 = scalar_lea.vmem %s686_s4, %s440_s9 }
  0x17   : > { %v447_v1 = vld [vmem:[%s618_s28] sm:$0xff]   ;;  %v470_v2 = vld [vmem:[%s618_s28 + $0x8] sm:$0xff]   ;;  %v471_v3 = vld [vmem:[%s618_s28 + $0x10] sm:$0xff]  }
  0x18   : > { %v448_v4 = vunpack.c.l.bf16 %v447_v1  ;;  %v449_v5 = vunpack.c.h.bf16 %v447_v1  ;;  %v452_v6 = vunpack.c.l.bf16 %v470_v2  ;;  %v453_v7 = vunpack.c.h.bf16 %v470_v2  ;;  %v472_v8 = vld [vmem:[%s618_s28 + $0x18] sm:$0xff]   ;;  %v473_v39 = vld [vmem:[%s618_s28 + $0x20] sm:$0xff]   ;;  %v474_v40 = vld [vmem:[%s618_s28 + $0x28] sm:$0xff]  }
  0x19   : > { %v456_v10 = vunpack.c.l.bf16 %v471_v3  ;;  %v457_v11 = vunpack.c.h.bf16 %v471_v3  ;;  %v460_v12 = vunpack.c.l.bf16 %v472_v8  ;;  %v461_v13 = vunpack.c.h.bf16 %v472_v8 }
  0x1a   : > { %v265_v14 = vsub.f32 %v448_v4, %v623_v0  ;;  %v266_v15 = vsub.f32 %v449_v5, %v623_v0  ;;  %v267_v16 = vsub.f32 %v452_v6, %v623_v0  ;;  %v268_v17 = vsub.f32 %v453_v7, %v623_v0 }
  0x1b   : > { %v269_v19 = vsub.f32 %v456_v10, %v623_v0  ;;  %v270_v20 = vsub.f32 %v457_v11, %v623_v0  ;;  %v271_v21 = vsub.f32 %v460_v12, %v623_v0  ;;  %v272_v22 = vsub.f32 %v461_v13, %v623_v0 }
  0x1c   : > { %v284_v23 = vmul.f32 %v442_v9, %v265_v14  ;;  %v285_v24 = vmul.f32 %v442_v9, %v266_v15  ;;  %v286_v25 = vmul.f32 %v442_v9, %v267_v16  ;;  %v287_v26 = vmul.f32 %v442_v9, %v268_v17 }
  0x1d   : > { %v288_v27 = vmul.f32 %v442_v9, %v269_v19  ;;  %v289_v28 = vmul.f32 %v442_v9, %v270_v20  ;;  %v290_v29 = vmul.f32 %v442_v9, %v271_v21  ;;  %v291_v30 = vmul.f32 %v442_v9, %v272_v22 }
  0x1e   : > { %v303_v31 = vadd.f32 %v443_v18, %v284_v23  ;;  %v304_v32 = vadd.f32 %v443_v18, %v285_v24  ;;  %v305_v33 = vadd.f32 %v443_v18, %v286_v25  ;;  %v306_v34 = vadd.f32 %v443_v18, %v287_v26 }
  0x1f   : > { %v307_v35 = vadd.f32 %v443_v18, %v288_v27  ;;  %v308_v36 = vadd.f32 %v443_v18, %v289_v28  ;;  %v309_v37 = vadd.f32 %v443_v18, %v290_v29  ;;  %v310_v38 = vadd.f32 %v443_v18, %v291_v30 }
  0x20   : > { %v315_v41 = vmax.f32 %v303_v31, 0.0  ;;  %v316_v42 = vmax.f32 %v304_v32, 0.0  ;;  %v317_v43 = vmax.f32 %v305_v33, 0.0  ;;  %v318_v44 = vmax.f32 %v306_v34, 0.0 }
  0x21   : > { %v319_v45 = vmax.f32 %v307_v35, 0.0  ;;  %v320_v46 = vmax.f32 %v308_v36, 0.0  ;;  %v321_v47 = vmax.f32 %v309_v37, 0.0  ;;  %v322_v48 = vmax.f32 %v310_v38, 0.0 }
  0x22   : > { %327 = vst [vmem:[%s647_s12] sm:$0xff] %v315_v41  ;;  %328 = vst [vmem:[%s647_s12 + $0x8] sm:$0xff] %v316_v42  ;;  %v464_v49 = vunpack.c.l.bf16 %v473_v39  ;;  %v465_v50 = vunpack.c.h.bf16 %v473_v39  ;;  %v468_v51 = vunpack.c.l.bf16 %v474_v40  ;;  %v469_v52 = vunpack.c.h.bf16 %v474_v40 }
  0x23   : > { %329 = vst [vmem:[%s647_s12 + $0x10] sm:$0xff] %v317_v43  ;;  %330 = vst [vmem:[%s647_s12 + $0x18] sm:$0xff] %v318_v44 }
  0x24   : > { %331 = vst [vmem:[%s647_s12 + $0x20] sm:$0xff] %v319_v45  ;;  %332 = vst [vmem:[%s647_s12 + $0x28] sm:$0xff] %v320_v46  ;;  %v273_v53 = vsub.f32 %v464_v49, %v623_v0  ;;  %v274_v54 = vsub.f32 %v465_v50, %v623_v0  ;;  %v275_v55 = vsub.f32 %v468_v51, %v623_v0 }
  0x25   : > { %333 = vst [vmem:[%s647_s12 + $0x30] sm:$0xff] %v321_v47  ;;  %334 = vst [vmem:[%s647_s12 + $0x38] sm:$0xff] %v322_v48  ;;  %v276_v56 = vsub.f32 %v469_v52, %v623_v0 }
  0x26   : > { %v292_v57 = vmul.f32 %v442_v9, %v273_v53  ;;  %v293_v58 = vmul.f32 %v442_v9, %v274_v54  ;;  %v294_v59 = vmul.f32 %v442_v9, %v275_v55 }
  0x27   : > { %v295_v60 = vmul.f32 %v442_v9, %v276_v56 }
  0x28   : > { %v311_v61 = vadd.f32 %v443_v18, %v292_v57  ;;  %v312_v62 = vadd.f32 %v443_v18, %v293_v58  ;;  %v313_v63 = vadd.f32 %v443_v18, %v294_v59 }
  0x29   : > { %v314_v1 = vadd.f32 %v443_v18, %v295_v60 }
  0x2a   : > { %v323_v2 = vmax.f32 %v311_v61, 0.0  ;;  %v324_v3 = vmax.f32 %v312_v62, 0.0  ;;  %v325_v4 = vmax.f32 %v313_v63, 0.0 }
  0x2b   : > { %v326_v5 = vmax.f32 %v314_v1, 0.0 }
  0x2c   : > { %335 = vst [vmem:[%s647_s12 + $0x40] sm:$0xff] %v323_v2  ;;  %336 = vst [vmem:[%s647_s12 + $0x48] sm:$0xff] %v324_v3 }
  0x2d   : > { %337 = vst [vmem:[%s647_s12 + $0x50] sm:$0xff] %v325_v4  ;;  %338 = vst [vmem:[%s647_s12 + $0x58] sm:$0xff] %v326_v5 }
  0x2e PF: > { %s14_s19 = sadd.s32 1, %s555_s19   ;;  %s687_s15 = smov %s547_s17 }
  0x2f   : > { %p11_p7 = scmp.ge.s32.totalorder %s14_s19, 8   ;;  %s688_s16 = smov %s551_s18 }
  0x30   : > { %s689_s17 = smov %s692_s20  ;;  %s690_s18 = smov %s696_s21 }
  0x31   :  { %13 = sbr.rel (!%p11_p7) target bundleno = 3 (0x3), region = 66 }

// kernel: dwblock_forward.2
= control target key start
LH: loop header
LB: loop body
LE: loop exit
PB: predicated region body
PF: predicated region fallthrough
CT: control target
= control target key end

     0   :  { %s3153_s12 = smov 0   ;;  %s3155_s13 = smov 0   ;;  %s4128_s0 = inlined_call_operand.vmem [shape: bf16[2,3,8,18,128], index: 0, kind: input, shape index: {}]   ;;  %s4129_s1 = inlined_call_operand.vmem [shape: bf16[1152,128], index: 1, kind: input, shape index: {}]   ;;  %s4130_s2 = inlined_call_operand.vmem [shape: bf16[2,3,96,128], index: 2, kind: output, shape index: {0}]   ;;  %s4131_s3 = inlined_call_operand.vmem [shape: f32[2,3,8,128], index: 3, kind: output, shape index: {1}]  }
   0x1   :  { %s3157_s14 = smov 0   ;;  %s3159_s15 = smov 0  }
   0x2   :  { %s3161_s16 = smov 0  }
   0x3 LB: > { %s23_s17 = sadd.s32 1, %s3122_s14  ;;  %s26_s18 = sadd.s32 1, %s3126_s15  ;;  %s3130_s16 = sphi %s3161_s16, %s14_s16   ;;  %s3126_s15 = sphi %s3159_s15, %s4139_s15   ;;  %s3122_s14 = sphi %s3157_s14, %s4138_s14   ;;  %s3118_s13 = sphi %s3155_s13, %s4137_s13   ;;  %s3114_s12 = sphi %s3153_s12, %s4136_s12  }
   0x4   : > { %p24_p0 = scmp.ge.s32.totalorder %s23_s17, 3  ;;  %p2432_p1 = scmp.ge.s32.totalorder %s3130_s16, 1 }
   0x5   : > { %p162_p2 = scmp.lt.s32.totalorder %s3130_s16, 7 }
   0x6   : > { %s4141_s17 = smov (%p24_p0, %s23_s17), 0  ;;  %s4143_s18 = smov (!%p24_p0, %s26_s18), %s3126_s15 }
   0x7   : > { %p163_p3 = pnand %p2432_p1, %p162_p2  ;;  %p28_p4 = scmp.ge.s32.totalorder %s4143_s18, 2 }
   0x8   : > { %v3002_v0 = vld [vmem:[%s4129_s1 + $0x40] sm:$0xff] (!%p163_p3)   ;;  %v3006_v4 = vld [vmem:[%s4129_s1 + $0x48] sm:$0xff] (!%p163_p3)   ;;  %v3010_v8 = vld [vmem:[%s4129_s1 + $0x50] sm:$0xff] (!%p163_p3)   ;;  %p202_p5 = scmp.lt.s32.totalorder (!%p163_p3), %s3118_s13, 1  ;;  %p204_p6 = scmp.lt.s32.totalorder (!%p163_p3), %s3114_s12, 2  ;;  %vm418_vm2 = vcmask (!%p163_p3), 1042432  }
   0x9   : > { %s4145_s18 = smov (%p28_p4, %s4143_s18), 0  ;;  %166 = sbr.rel (%p163_p3) target bundleno = 397 (0x18d), region = 28 }
   0xa   : > { %v3003_v1 = vld [vmem:[%s4129_s1 + $0xc0] sm:$0xff] (!%p163_p3)   ;;  %2690 = vmatprep.subr.bf16.mxu0 (!%p163_p3), %v3002_v0  ;;  %v3007_v5 = vld [vmem:[%s4129_s1 + $0xc8] sm:$0xff] (!%p163_p3)   ;;  %v3011_v9 = vld [vmem:[%s4129_s1 + $0xd0] sm:$0xff] (!%p163_p3)   ;;  %vm247_vm0 = vsmask.f32 (!%p163_p3), 3328  ;;  %vm419_vm3 = vcmask (!%p163_p3), 1046532  }
   0xb   : > { %v3004_v2 = vld [vmem:[%s4129_s1] sm:$0xff] (!%p163_p3)   ;;  %2742 = vmatprep.subr.bf16.mxu1 (!%p163_p3), %v3003_v1  ;;  %v3008_v6 = vld [vmem:[%s4129_s1 + $0x8] sm:$0xff] (!%p163_p3)   ;;  %v3012_v10 = vld [vmem:[%s4129_s1 + $0x10] sm:$0xff] (!%p163_p3)   ;;  %vm248_vm1 = vsmask.f32 (!%p163_p3), 7440  ;;  %s2196_s26 = smul.u32 (!%p163_p3), 6, %s3114_s12 }
   0xc   : > { %v3005_v3 = vld [vmem:[%s4129_s1 + $0x80] sm:$0xff] (!%p163_p3)   ;;  %2691 = vmatpush3.bf16.msra.mxu0 (!%p163_p3), %v3004_v2  ;;  %v3009_v7 = vld [vmem:[%s4129_s1 + $0x88] sm:$0xff] (!%p163_p3)   ;;  %v3013_v11 = vld [vmem:[%s4129_s1 + $0x90] sm:$0xff] (!%p163_p3)  }
   0xd   : > { %2743 = vmatpush3.bf16.msra.mxu1 (!%p163_p3), %v3005_v3  ;;  %2692 = vmatprep.subr.bf16.mxu0 (!%p163_p3), %v3006_v4  ;;  %v3014_v12 = vld [vmem:[%s4129_s1 + $0x58] sm:$0xff] (!%p163_p3)   ;;  %v3018_v16 = vld [vmem:[%s4129_s1 + $0x60] sm:$0xff] (!%p163_p3)   ;;  %v3022_v20 = vld [vmem:[%s4129_s1 + $0x68] sm:$0xff] (!%p163_p3)   ;;  %s2197_s29 = ssub.s32 (!%p163_p3), 16, %s2196_s26 }
   0xe   : > { %2744 = vmatprep.subr.bf16.mxu1 (!%p163_p3), %v3007_v5  ;;  %v3015_v13 = vld [vmem:[%s4129_s1 + $0xd8] sm:$0xff] (!%p163_p3)   ;;  %v3019_v17 = vld [vmem:[%s4129_s1 + $0xe0] sm:$0xff] (!%p163_p3)   ;;  %v3023_v21 = vld [vmem:[%s4129_s1 + $0xe8] sm:$0xff] (!%p163_p3)  }
   0xf   : > { %v3016_v14 = vld [vmem:[%s4129_s1 + $0x18] sm:$0xff] (!%p163_p3)   ;;  %v3020_v18 = vld [vmem:[%s4129_s1 + $0x20] sm:$0xff] (!%p163_p3)   ;;  %v3024_v22 = vld [vmem:[%s4129_s1 + $0x28] sm:$0xff] (!%p163_p3)  }
  0x10   : > { %2693 = vmatpush3.bf16.msra.mxu0 %v3008_v6  ;;  %s4147_s13 = smov (!%p202_p5, %s3118_s13), 1  ;;  %v3017_v15 = vld [vmem:[%s4129_s1 + $0x98] sm:$0xff]   ;;  %v3021_v19 = vld [vmem:[%s4129_s1 + $0xa0] sm:$0xff]   ;;  %v3025_v23 = vld [vmem:[%s4129_s1 + $0xa8] sm:$0xff]  }
  0x11   : > { %2745 = vmatpush3.bf16.msra.mxu1 %v3009_v7  ;;  %2694 = vmatprep.subr.bf16.mxu0 %v3010_v8  ;;  %s3241_s4 = scalar_select %p204_p6, %s3114_s12, 2  ;;  %v3026_v24 = vld [vmem:[%s4129_s1 + $0x70] sm:$0xff]   ;;  %v3030_v28 = vld [vmem:[%s4129_s1 + $0x78] sm:$0xff]   ;;  %v3036_v54 = vld [vmem:[%s4129_s1 + $0x140] sm:$0xff]  }
  0x12   : > { %2746 = vmatprep.subr.bf16.mxu1 %v3011_v9  ;;  %s2957_s11 = smul.u32 72, %s4147_s13  ;;  %v3027_v25 = vld [vmem:[%s4129_s1 + $0xf0] sm:$0xff]   ;;  %v3031_v29 = vld [vmem:[%s4129_s1 + $0xf8] sm:$0xff]   ;;  %vm3324_vm4 = vmor %vm247_vm0, %vm248_vm1  ;;  %s2640_s12 = sshll.u32 %s2197_s29, 4 }
  0x13   : > { %s2956_s21 = smul.u32 24, %s3241_s4  ;;  %v3028_v26 = vld [vmem:[%s4129_s1 + $0x30] sm:$0xff]   ;;  %v3032_v30 = vld [vmem:[%s4129_s1 + $0x38] sm:$0xff]   ;;  %vm3334_vm5 = vmor %vm418_vm2, %vm419_vm3 }
  0x14   : > { %2695 = vmatpush3.bf16.msra.mxu0 %v3012_v10  ;;  %v3029_v27 = vld [vmem:[%s4129_s1 + $0xb0] sm:$0xff]   ;;  %v3033_v31 = vld [vmem:[%s4129_s1 + $0xb8] sm:$0xff]   ;;  %v3037_v9 = vld [vmem:[%s4129_s1 + $0x100] sm:$0xff]   ;;  %s2958_s28 = smul.u32 12, %s3241_s4 }
  0x15   : > { %2747 = vmatpush3.bf16.msra.mxu1 %v3013_v11  ;;  %2696 = vmatprep.subr.bf16.mxu0 %v3014_v12  ;;  %s208_s30 = sadd.s32 %s2957_s11, %s2956_s21  ;;  %v3042_v11 = vld [vmem:[%s4129_s1 + $0x1c0] sm:$0xff]  }
  0x16   : > { %2748 = vmatprep.subr.bf16.mxu1 %v3015_v13  ;;  %s2433_s19 = sshll.u32 %s208_s30, 2  ;;  %s2959_s30 = smul.u32 36, %s4147_s13 }
  0x17   : > { %s3290_s27 = scalar_lea.vmem %s4128_s0, %s2433_s19 }
  0x18   : > { %2697 = vmatpush3.bf16.msra.mxu0 %v3016_v14  ;;  %v3299_v32 = vld [vmem:[%s3290_s27] sm:$0xf]  ;;  %v3302_v33 = vld [vmem:[%s3290_s27 + $0x4] sm:$0xf]  ;;  %v3305_v34 = vld [vmem:[%s3290_s27 + $0x8] sm:$0x1] }
  0x19   : > { %2749 = vmatpush3.bf16.msra.mxu1 %v3017_v15  ;;  %2698 = vmatprep.subr.bf16.mxu0 %v3018_v16  ;;  %v251_v35 = vshrl.u32 %v3299_v32, 16  ;;  %v254_v36 = vshll.u32 %v3299_v32, 16  ;;  %v260_v37 = vshll.u32 %v3302_v33, 16  ;;  %v264_v38 = vshrl.u32 %v3302_v33, 16  ;;  %v2442_v40 = vld [vmem:[%s3290_s27 + $0xc] sm:$0xf] }
  0x1a   : > { %2750 = vmatprep.subr.bf16.mxu1 %v3019_v17  ;;  %v270_v39 = vshll.u32 %v3305_v34, 16  ;;  %v3314_v43 = vld [vmem:[%s3290_s27 + $0x10] sm:$0xf]  ;;  %v483_v44 = vshrl.u32 %v2442_v40, 16  ;;  %v486_v45 = vshll.u32 %v2442_v40, 16  ;;  %v426_v61 = vrot.slane %v3305_v34, 5 }
  0x1b   : > { %v253_v41 = vrot.slane %v251_v35, 4  ;;  %v256_v42 = vrot.slane %v254_v36, 5  ;;  %v262_v46 = vrot.slane %v260_v37, 5  ;;  %v266_v47 = vrot.slane %v264_v38, 4  ;;  %v394_v49 = vld [vmem:[%s3290_s27] sm:$0xe] }
  0x1c   : > { %2699 = vmatpush3.bf16.msra.mxu0 %v3020_v18  ;;  %v492_v48 = vshll.u32 %v3314_v43, 16  ;;  %v485_v51 = vrot.slane %v483_v44, 4  ;;  %v488_v52 = vrot.slane %v486_v45, 5  ;;  %v496_v53 = vshrl.u32 %v3314_v43, 16  ;;  %v3351_v10 = vld [vmem:[%s3290_s27 + $0xc] sm:$0xf] }
  0x1d   : > { %2751 = vmatpush3.bf16.msra.mxu1 %v3021_v19  ;;  %2700 = vmatprep.subr.bf16.mxu0 %v3022_v20  ;;  %v257_v50 = vor.u32 %v256_v42, %v253_v41  ;;  %v267_v56 = vor.u32 %v266_v47, %v262_v46  ;;  %v272_v57 = vrot.slane %v270_v39, 5  ;;  %v2520_v59 = vcombine.low %v2442_v40, %v3314_v43  ;;  %v3038_v15 = vld [vmem:[%s4129_s1 + $0x148] sm:$0xff]   ;;  %v3364_v16 = vld [vmem:[%s3290_s27 + $0x10] sm:$0xf]  ;;  %v242_v17 = vld [vmem:[%s3290_s27 + $0x14] sm:$0x1] }
  0x1e   : > { %2752 = vmatprep.subr.bf16.mxu1 %v3023_v21  ;;  %v3328_v58 = vrot.slane %v492_v48, 5  ;;  %v489_v62 = vor.u32 %v488_v52, %v485_v51  ;;  %v498_v63 = vrot.slane %v496_v53, 4  ;;  %v652_v2 = vrot.slane %v3314_v43, 5  ;;  %v395_v38 = vld [vmem:[%s3290_s27 + $0xc] sm:$0xe]  ;;  %v3044_v39 = vld [vmem:[%s4129_s1 + $0x150] sm:$0xff]  }
  0x1f   : > { %v258_v60 = vrot.slane %v257_v50, 4  ;;  %v268_v1 = vrot.slane %v267_v56, 4  ;;  %1844 = vmatprep.mubr.bf16.mxu1 %v2520_v59  ;;  %v2436_v3 = vrot.slane %v394_v49, 9  ;;  %v423_v4 = vrot.slane %v3302_v33, 5  ;;  %v3045_v51 = vld [vmem:[%s4129_s1 + $0x110] sm:$0xff]   ;;  %v3046_v53 = vld [vmem:[%s4129_s1 + $0x1c8] sm:$0xff]  }
  0x20   : > { %2701 = vmatpush3.bf16.msra.mxu0 %v3024_v22  ;;  %v3342_v6 = vrot.slane %v489_v62, 4  ;;  %v499_v7 = vor.u32 %v498_v63, %v3328_v58  ;;  %v2502_v8 = vcombine.low %v3299_v32, %v3302_v33  ;;  %v275_v18 = vshrl.u32 %v3351_v10, 16  ;;  %v2444_v22 = vld [vmem:[%s3290_s27 + $0x18] sm:$0xf]  ;;  %v3040_v33 = vld [vmem:[%s4129_s1 + $0x108] sm:$0xff]  }
  0x21   : > { %2753 = vmatpush3.bf16.msra.mxu1 %v3025_v23  ;;  %2702 = vmatprep.subr.bf16.mxu0 %v3026_v24  ;;  %v263_v5 = vsel %vm3324_vm4, %v258_v60, %v262_v46  ;;  %v273_v12 = vsel %vm3324_vm4, %v268_v1, %v272_v57  ;;  %v424_v13 = vsel %vm3334_vm5, %v2436_v3, %v423_v4  ;;  %v425_v14 = vrot.slane %v423_v4, 4  ;;  %v3373_v23 = vld [vmem:[%s3290_s27 + $0x1c] sm:$0xf]  ;;  %v3048_v59 = vld [vmem:[%s4129_s1 + $0x188] sm:$0xff]   ;;  %v3414_v62 = vld [vmem:[%s3290_s27 + $0x18] sm:$0xf] }
  0x22   : > { %2754 = vmatprep.subr.bf16.mxu1 %v3027_v25  ;;  %v2508_v19 = vcombine.low %v263_v5, %v273_v12  ;;  %v3368_v20 = vrot.slane %v499_v7, 4  ;;  %v278_v21 = vshll.u32 %v3351_v10, 16  ;;  %v277_v25 = vrot.slane %v275_v18, 4  ;;  %v3417_v63 = vld [vmem:[%s3290_s27 + $0x1c] sm:$0xf] }
  0x23   : > { %v427_v24 = vsel %vm3334_vm5, %v425_v14, %v426_v61  ;;  %v507_v32 = vshrl.u32 %v2444_v22, 16  ;;  %v510_v36 = vshll.u32 %v2444_v22, 16  ;;  %v520_v37 = vshrl.u32 %v3373_v23, 16  ;;  %v243_v4 = vld [vmem:[%s3290_s27 + $0x20] sm:$0x1]  ;;  %v3050_v14 = vld [vmem:[%s4129_s1 + $0x158] sm:$0xff]  }
  0x24   : > { %2703 = vmatpush3.bf16.msra.mxu0 %v3028_v26  ;;  %v284_v26 = vshll.u32 %v3364_v16, 16  ;;  %1763 = vmatprep.mubr.bf16.mxu0 %v2508_v19  ;;  %v2521_v44 = vcombine.low %v2444_v22, %v3373_v23  ;;  %v2437_v47 = vrot.slane %v395_v38, 9  ;;  %v430_v49 = vrot.slane %v3364_v16, 5 }
  0x25   : > { %2755 = vmatpush3.bf16.msra.mxu1 %v3029_v27  ;;  %2704 = vmatprep.subr.bf16.mxu0 %v3030_v28  ;;  %v288_v27 = vshrl.u32 %v3364_v16, 16  ;;  %v3043_v28 = vld [vmem:[%s4129_s1 + $0x180] sm:$0xff]   ;;  %v3390_v42 = vrot.slane %v507_v32, 4  ;;  %v3393_v46 = vrot.slane %v510_v36, 5  ;;  %v433_v50 = vrot.slane %v242_v17, 5  ;;  %v3052_v36 = vld [vmem:[%s4129_s1 + $0x1d0] sm:$0xff]  }
  0x26   : > { %2756 = vmatprep.subr.bf16.mxu1 %v3031_v29  ;;  %v2514_v29 = vcombine.low %v424_v13, %v427_v24  ;;  %v286_v34 = vrot.slane %v284_v26, 5  ;;  %v431_v56 = vsel %vm3334_vm5, %v2437_v47, %v430_v49  ;;  %v432_v57 = vrot.slane %v430_v49, 4  ;;  %v3428_v13 = vld [vmem:[%s3290_s27 + $0x28] sm:$0xf] }
  0x27   : > { %v290_v35 = vrot.slane %v288_v27, 4  ;;  %v2503_v61 = vcombine.low %v3351_v10, %v3364_v16  ;;  %v299_v5 = vshrl.u32 %v3414_v62, 16  ;;  %v302_v7 = vshll.u32 %v3414_v62, 16 }
  0x28   : > { %2705 = vmatpush3.bf16.msra.mxu0 %v3032_v30  ;;  %v280_v30 = vrot.slane %v278_v21, 5  ;;  %v434_v3 = vsel %vm3334_vm5, %v432_v57, %v433_v50  ;;  %v308_v10 = vshll.u32 %v3417_v63, 16  ;;  %v318_v12 = vshll.u32 %v243_v4, 16  ;;  %v3465_v50 = vld [vmem:[%s3290_s27 + $0x24] sm:$0xf] }
  0x29   : > { %2757 = vmatpush3.bf16.msra.mxu1 %v3033_v31  ;;  %2794 = vmatprep.subr.bf16.mxu0 %v3036_v54  ;;  %v294_v31 = vshll.u32 %v242_v17, 16  ;;  %v291_v45 = vor.u32 %v290_v35, %v286_v34  ;;  %v304_v16 = vrot.slane %v302_v7, 5  ;;  %v544_v24 = vshrl.u32 %v3428_v13, 16  ;;  %v3051_v35 = vld [vmem:[%s4129_s1 + $0x118] sm:$0xff]  }
  0x2a   : > { %2846 = vmatprep.subr.bf16.mxu1 %v3042_v11  ;;  %v281_v40 = vor.u32 %v280_v30, %v277_v25  ;;  %v312_v11 = vshrl.u32 %v3417_v63, 16  ;;  %v310_v19 = vrot.slane %v308_v10, 5  ;;  %v320_v22 = vrot.slane %v318_v12, 5 }
  0x2b   : > { %1764 = vmatmul.mubr.bf16.vlgmr.msra.gmra.mrb[0].mxu0 %v2502_v8  ;;  %v296_v41 = vrot.slane %v294_v31, 5  ;;  %v292_v52 = vrot.slane %v291_v45, 4  ;;  %v2446_v8 = vld [vmem:[%s3290_s27 + $0x24] sm:$0xf]  ;;  %v437_v32 = vrot.slane %v3417_v63, 5  ;;  %v3456_v45 = vrot.slane %v652_v2, 4 }
  0x2c   : > { %1845 = vmatmul.mubr.bf16.vlgmr.msra.gmra.mrb[0].mxu1 %v2514_v29  ;;  %2795 = vmatpush3.bf16.msra.mxu0 %v3037_v9  ;;  %v282_v48 = vrot.slane %v281_v40, 4  ;;  %v2515_v9 = vcombine.low %v431_v56, %v434_v3  ;;  %v531_v17 = vshrl.u32 %v2446_v8, 16  ;;  %v534_v18 = vshll.u32 %v2446_v8, 16  ;;  %v396_v29 = vld [vmem:[%s3290_s27 + $0x18] sm:$0xe] }
  0x2d   : > { %2796 = vmatprep.subr.bf16.mxu0 %v3038_v15  ;;  %2847 = vmatpush3.bf16.msra.mxu1 %v3043_v28  ;;  %v297_v60 = vsel %vm3324_vm4, %v292_v52, %v296_v41  ;;  %v301_v15 = vrot.slane %v299_v5, 4  ;;  %v314_v21 = vrot.slane %v312_v11, 4  ;;  %v2522_v28 = vcombine.low %v2446_v8, %v3428_v13  ;;  %v244_v52 = vld [vmem:[%s3290_s27 + $0x2c] sm:$0x1]  ;;  %v397_v3 = vld [vmem:[%s3290_s27 + $0x24] sm:$0xe] }
  0x2e   : > { %1852 = vmatprep.mubr.bf16.mxu1 %v2521_v44  ;;  %v287_v54 = vsel %vm3324_vm4, %v282_v48, %v286_v34  ;;  %2848 = vmatprep.subr.bf16.mxu1 %v3046_v53  ;;  %v3434_v26 = vrot.slane %v531_v17, 4  ;;  %v3436_v27 = vrot.slane %v534_v18, 5  ;;  %v2438_v31 = vrot.slane %v396_v29, 9  ;;  %v3053_v44 = vld [vmem:[%s4129_s1 + $0x190] sm:$0xff]   ;;  %v3056_v17 = vld [vmem:[%s4129_s1 + $0x160] sm:$0xff]   ;;  %v3058_v29 = vld [vmem:[%s4129_s1 + $0x1d8] sm:$0xff]  }
  0x2f   : > { %v2509_v1 = vcombine.low %v287_v54, %v297_v60  ;;  %v305_v25 = vor.u32 %v304_v16, %v301_v15  ;;  %v315_v30 = vor.u32 %v314_v21, %v310_v19  ;;  %v440_v34 = vrot.slane %v243_v4, 5  ;;  %v3475_v60 = vld [vmem:[%s3290_s27 + $0x34] sm:$0xf] }
  0x30   : > { %2797 = vmatpush3.bf16.msra.mxu0 %v3040_v33  ;;  %v439_v40 = vrot.slane %v437_v32, 4  ;;  %v2504_v48 = vcombine.low %v3414_v62, %v3417_v63  ;;  %v323_v56 = vshrl.u32 %v3465_v50, 16  ;;  %v326_v57 = vshll.u32 %v3465_v50, 16 }
  0x31   : > { %2798 = vmatprep.subr.bf16.mxu0 %v3044_v39  ;;  %2849 = vmatpush3.bf16.msra.mxu1 %v3048_v59  ;;  %v306_v33 = vrot.slane %v305_v25, 4  ;;  %v316_v38 = vrot.slane %v315_v30, 4  ;;  %v438_v39 = vsel %vm3334_vm5, %v2438_v31, %v437_v32  ;;  %v2448_v59 = vld [vmem:[%s3290_s27 + $0x30] sm:$0xf]  ;;  %v342_v63 = vshll.u32 %v244_v52, 16  ;;  %v3057_v25 = vld [vmem:[%s4129_s1 + $0x120] sm:$0xff]  }
  0x32   : > { %1771 = vmatprep.mubr.bf16.mxu0 %v2509_v1  ;;  %2850 = vmatprep.subr.bf16.mxu1 %v3052_v36  ;;  %v441_v49 = vsel %vm3334_vm5, %v439_v40, %v440_v34  ;;  %v555_v1 = vshrl.u32 %v2448_v59, 16  ;;  %v325_v4 = vrot.slane %v323_v56, 4  ;;  %v328_v5 = vrot.slane %v326_v57, 5  ;;  %v3060_v34 = vld [vmem:[%s4129_s1 + $0x168] sm:$0xff]  }
  0x33   : > { %1772 = vmatmul.mubr.bf16.gmra.mrb[4].mxu0 %v2503_v61  ;;  %v311_v41 = vsel %vm3324_vm4, %v306_v33, %v310_v19  ;;  %v321_v47 = vsel %vm3324_vm4, %v316_v38, %v320_v22  ;;  %v2516_v54 = vcombine.low %v438_v39, %v441_v49  ;;  %v558_v7 = vshll.u32 %v2448_v59, 16  ;;  %v3059_v33 = vld [vmem:[%s4129_s1 + $0x198] sm:$0xff]   ;;  %v3509_v38 = vld [vmem:[%s3290_s27 + $0x30] sm:$0xf] }
  0x34   : > { %2799 = vmatpush3.bf16.msra.mxu0 %v3045_v51  ;;  %1853 = vmatmul.mubr.bf16.gmra.mrb[4].mxu1 %v2515_v9  ;;  %v3468_v51 = vld [vmem:[%s3290_s27 + $0x28] sm:$0xf]  ;;  %v2510_v53 = vcombine.low %v311_v41, %v321_v47  ;;  %v568_v8 = vshrl.u32 %v3475_v60, 16  ;;  %v344_v11 = vrot.slane %v342_v63, 5  ;;  %v3481_v12 = vrot.slane %v555_v1, 4 }
  0x35   : > { %2800 = vmatprep.subr.bf16.mxu0 %v3050_v14  ;;  %1860 = vmatprep.mubr.bf16.mxu1 %v2522_v28  ;;  %v332_v61 = vshll.u32 %v3468_v51, 16  ;;  %v336_v62 = vshrl.u32 %v3468_v51, 16  ;;  %v329_v14 = vor.u32 %v328_v5, %v325_v4  ;;  %v3483_v15 = vrot.slane %v558_v7, 5  ;;  %v3516_v41 = vld [vmem:[%s3290_s27 + $0x34] sm:$0xf] }
  0x36   : > { %2851 = vmatpush3.bf16.msra.mxu1 %v3053_v44  ;;  %1779 = vmatprep.mubr.bf16.mxu0 %v2510_v53  ;;  %v2523_v16 = vcombine.low %v2448_v59, %v3475_v60  ;;  %v2439_v19 = vrot.slane %v397_v3, 9  ;;  %v444_v21 = vrot.slane %v3468_v51, 5  ;;  %v447_v22 = vrot.slane %v244_v52, 5  ;;  %v245_v44 = vld [vmem:[%s3290_s27 + $0x38] sm:$0x1] }
  0x37   : > { %v334_v9 = vrot.slane %v332_v61, 5  ;;  %v338_v10 = vrot.slane %v336_v62, 4  ;;  %v330_v28 = vrot.slane %v329_v14, 4  ;;  %v2505_v36 = vcombine.low %v3465_v50, %v3468_v51  ;;  %2852 = vmatprep.subr.bf16.mxu1 %v3058_v29  ;;  %v2450_v53 = vld [vmem:[%s3290_s27 + $0x3c] sm:$0xf]  ;;  %v3064_v14 = vld [vmem:[%s4129_s1 + $0x1e0] sm:$0xff]  }
  0x38   : > { %2801 = vmatpush3.bf16.msra.mxu0 %v3051_v35  ;;  %v445_v31 = vsel %vm3334_vm5, %v2439_v19, %v444_v21  ;;  %v446_v32 = vrot.slane %v444_v21, 4  ;;  %v347_v47 = vshrl.u32 %v3509_v38, 16  ;;  %v356_v51 = vshll.u32 %v3516_v41, 16  ;;  %v3066_v29 = vld [vmem:[%s4129_s1 + $0x170] sm:$0xff]  }
  0x39   : > { %v339_v18 = vor.u32 %v338_v10, %v334_v9  ;;  %2802 = vmatprep.subr.bf16.mxu0 %v3056_v17  ;;  %v335_v35 = vsel %vm3324_vm4, %v330_v28, %v334_v9  ;;  %v360_v52 = vshrl.u32 %v3516_v41, 16  ;;  %v366_v59 = vshll.u32 %v245_v44, 16  ;;  %v3062_v10 = vld [vmem:[%s4129_s1 + $0x128] sm:$0xff]  }
  0x3a   : > { %v448_v40 = vsel %vm3334_vm5, %v446_v32, %v447_v22  ;;  %2853 = vmatpush3.bf16.msra.mxu1 %v3059_v33  ;;  %v349_v56 = vrot.slane %v347_v47, 4  ;;  %v579_v61 = vshrl.u32 %v2450_v53, 16  ;;  %v358_v62 = vrot.slane %v356_v51, 5  ;;  %v3069_v47 = vld [vmem:[%s4129_s1 + $0x1a8] sm:$0xff]  }
  0x3b   : > { %1780 = vmatmul.mubr.bf16.gmra.mrb[8].mxu0 %v2504_v48  ;;  %v340_v30 = vrot.slane %v339_v18, 4  ;;  %v350_v48 = vshll.u32 %v3509_v38, 16  ;;  %v2517_v50 = vcombine.low %v445_v31, %v448_v40  ;;  %v362_v63 = vrot.slane %v360_v52, 4  ;;  %2854 = vmatprep.subr.bf16.mxu1 %v3064_v14 }
  0x3c   : > { %1861 = vmatmul.mubr.bf16.gmra.mrb[8].mxu1 %v2516_v54  ;;  %2803 = vmatpush3.bf16.msra.mxu0 %v3057_v25  ;;  %v3525_v54 = vld [vmem:[%s3290_s27 + $0x40] sm:$0xf]  ;;  %v582_v1 = vshll.u32 %v2450_v53, 16  ;;  %v368_v5 = vrot.slane %v366_v59, 5  ;;  %v3528_v7 = vrot.slane %v579_v61, 4  ;;  %v451_v21 = vrot.slane %v3516_v41, 5 }
  0x3d   : > { %1868 = vmatprep.mubr.bf16.mxu1 %v2523_v16  ;;  %v345_v39 = vsel %vm3324_vm4, %v340_v30, %v344_v11  ;;  %2804 = vmatprep.subr.bf16.mxu0 %v3060_v34  ;;  %v352_v57 = vrot.slane %v350_v48, 5  ;;  %v592_v3 = vshrl.u32 %v3525_v54, 16  ;;  %v2524_v9 = vcombine.low %v2450_v53, %v3525_v54  ;;  %v398_v11 = vld [vmem:[%s3290_s27 + $0x30] sm:$0xe]  ;;  %v3065_v25 = vld [vmem:[%s4129_s1 + $0x1a0] sm:$0xff]   ;;  %v3067_v34 = vld [vmem:[%s4129_s1 + $0x1e8] sm:$0xff]  }
  0x3e   : > { %v2511_v49 = vcombine.low %v335_v35, %v345_v39  ;;  %v363_v16 = vor.u32 %v362_v63, %v358_v62  ;;  %v3538_v17 = vrot.slane %v582_v1, 5  ;;  %v2440_v18 = vrot.slane %v398_v11, 9  ;;  %2855 = vmatpush3.bf16.msra.mxu1 %v3065_v25  ;;  %v3068_v39 = vld [vmem:[%s4129_s1 + $0x130] sm:$0xff]   ;;  %v3584_v59 = vld [vmem:[%s3290_s27 + $0x4c] sm:$0xf] }
  0x3f   : > { %v353_v4 = vor.u32 %v352_v57, %v349_v56  ;;  %v454_v22 = vrot.slane %v245_v44, 5  ;;  %v513_v30 = vor.u32 %v3393_v46, %v3390_v42  ;;  %v453_v33 = vrot.slane %v451_v21, 4  ;;  %2856 = vmatprep.subr.bf16.mxu1 %v3067_v34  ;;  %v2452_v57 = vld [vmem:[%s3290_s27 + $0x48] sm:$0xf]  ;;  %v3073_v34 = vld [vmem:[%s4129_s1 + $0x1b0] sm:$0xff]  }
  0x40   : > { %1787 = vmatprep.mubr.bf16.mxu0 %v2511_v49  ;;  %2805 = vmatpush3.bf16.msra.mxu0 %v3062_v10  ;;  %v364_v28 = vrot.slane %v363_v16, 4  ;;  %v452_v32 = vsel %vm3334_vm5, %v2440_v18, %v451_v21  ;;  %v2506_v42 = vcombine.low %v3509_v38, %v3516_v41  ;;  %v659_v40 = vrot.slane %v3373_v23, 5  ;;  %v3570_v38 = vld [vmem:[%s3290_s27 + $0x3c] sm:$0xf]  ;;  %v3573_v41 = vld [vmem:[%s3290_s27 + $0x40] sm:$0xf] }
  0x41   : > { %v354_v19 = vrot.slane %v353_v4, 4  ;;  %2806 = vmatprep.subr.bf16.mxu0 %v3066_v29  ;;  %v3575_v48 = vrot.slane %v513_v30, 4  ;;  %v246_v49 = vld [vmem:[%s3290_s27 + $0x44] sm:$0x1]  ;;  %v374_v51 = vshll.u32 %v3570_v38, 16  ;;  %v380_v52 = vshll.u32 %v3573_v41, 16 }
  0x42   : > { %v369_v35 = vsel %vm3324_vm4, %v364_v28, %v368_v5  ;;  %v384_v53 = vshrl.u32 %v3573_v41, 16  ;;  %v390_v56 = vshll.u32 %v246_v49, 16  ;;  %v458_v61 = vrot.slane %v3573_v41, 5  ;;  %2857 = vmatpush3.bf16.msra.mxu1 %v3069_v47  ;;  %v399_v5 = vld [vmem:[%s3290_s27 + $0x3c] sm:$0xe] }
  0x43   : > { %1788 = vmatmul.mubr.bf16.gmra.mrb[12].mxu0 %v2505_v36  ;;  %v359_v31 = vsel %vm3324_vm4, %v354_v19, %v358_v62  ;;  %v455_v36 = vsel %vm3334_vm5, %v453_v33, %v454_v22  ;;  %v376_v63 = vrot.slane %v374_v51, 5  ;;  %v382_v1 = vrot.slane %v380_v52, 5  ;;  %v3072_v22 = vld [vmem:[%s4129_s1 + $0x1f0] sm:$0xff]   ;;  %v3075_v47 = vld [vmem:[%s4129_s1 + $0x138] sm:$0xff]  }
  0x44   : > { %1869 = vmatmul.mubr.bf16.gmra.mrb[12].mxu1 %v2517_v50  ;;  %v2512_v46 = vcombine.low %v359_v31, %v369_v35  ;;  %v2518_v44 = vcombine.low %v452_v32, %v455_v36  ;;  %2807 = vmatpush3.bf16.msra.mxu0 %v3068_v39  ;;  %v371_v50 = vshrl.u32 %v3570_v38, 16  ;;  %v386_v4 = vrot.slane %v384_v53, 4  ;;  %v3074_v35 = vld [vmem:[%s4129_s1 + $0x178] sm:$0xff]   ;;  %v2454_v52 = vld [vmem:[%s3290_s27 + $0x14] sm:$0x1] }
  0x45   : > { %1876 = vmatprep.mubr.bf16.mxu1 %v2524_v9  ;;  %v392_v9 = vrot.slane %v390_v56, 5  ;;  %v603_v10 = vshrl.u32 %v2452_v57, 16  ;;  %v606_v11 = vshll.u32 %v2452_v57, 16  ;;  %v616_v14 = vshrl.u32 %v3584_v59, 16  ;;  %2858 = vmatprep.subr.bf16.mxu1 %v3072_v22  ;;  %v3077_v51 = vld [vmem:[%s4129_s1 + $0x1b8] sm:$0xff]  }
  0x46   : > { %1795 = vmatprep.mubr.bf16.mxu0 %v2512_v46  ;;  %v373_v62 = vrot.slane %v371_v50, 4  ;;  %v387_v18 = vor.u32 %v386_v4, %v382_v1  ;;  %v2525_v19 = vcombine.low %v2452_v57, %v3584_v59  ;;  %v2441_v21 = vrot.slane %v399_v5, 9  ;;  %2859 = vmatpush3.bf16.msra.mxu1 %v3073_v34  ;;  %v2460_v53 = vld [vmem:[%s3290_s27 + $0xc] sm:$0xe]  ;;  %v3641_v4 = vld [vmem:[%s4129_s1 + $0x200] sm:$0xff]  }
  0x47   : > { %v3593_v25 = vrot.slane %v603_v10, 4  ;;  %v3595_v28 = vrot.slane %v606_v11, 5  ;;  %v460_v29 = vrot.slane %v458_v61, 4  ;;  %v461_v30 = vrot.slane %v246_v49, 5  ;;  %2808 = vmatprep.subr.bf16.mxu0 %v3074_v35  ;;  %v3076_v49 = vld [vmem:[%s4129_s1 + $0x1f8] sm:$0xff]  }
  0x48   : > { %v377_v16 = vor.u32 %v376_v63, %v373_v62  ;;  %v388_v32 = vrot.slane %v387_v18, 4  ;;  %v459_v33 = vsel %vm3334_vm5, %v2441_v21, %v458_v61  ;;  %v516_v50 = vshll.u32 %v3373_v23, 16  ;;  %2809 = vmatpush3.bf16.msra.mxu0 %v3075_v47  ;;  %2860 = vmatprep.subr.bf16.mxu1 %v3076_v49  ;;  %v3647_v5 = vld [vmem:[%s3290_s27 + $0x20] sm:$0x1]  ;;  %v3688_v49 = vld [vmem:[%s3290_s27 + $0x2c] sm:$0x1] }
  0x49   : > { %v462_v46 = vsel %vm3334_vm5, %v460_v29, %v461_v30  ;;  %v3629_v56 = vrot.slane %v520_v37, 4  ;;  %v495_v57 = vsel %vm3324_vm4, %v3342_v6, %v3328_v58  ;;  %v502_v61 = vshll.u32 %v2454_v52, 16  ;;  %v3644_v37 = vld [vmem:[%s3290_s27 + $0x1c] sm:$0xf]  ;;  %2912 = vmatprep.subr.bf16.mxu0 %v3641_v4 }
  0x4a   : > { %v378_v31 = vrot.slane %v377_v16, 4  ;;  %v393_v39 = vsel %vm3324_vm4, %v388_v32, %v392_v9  ;;  %v2466_v62 = vrot.slane %v2460_v53, 9  ;;  %v655_v63 = vrot.slane %v2454_v52, 5  ;;  %2861 = vmatpush3.bf16.msra.mxu1 %v3077_v51 }
  0x4b   : > { %1796 = vmatmul.mubr.bf16.gmra.mrb[16].mxu0 %v2506_v42  ;;  %v2507_v42 = vcombine.low %v3570_v38, %v3573_v41  ;;  %v661_v38 = vrot.slane %v659_v40, 4  ;;  %v537_v9 = vor.u32 %v3436_v27, %v3434_v26  ;;  %v561_v10 = vor.u32 %v3483_v15, %v3481_v12  ;;  %2940 = vmatprep.subr.bf16.mxu1 %v3641_v4  ;;  %v3843_v12 = vld [vmem:[%s3290_s27 + $0x48] sm:$0xf] }
  0x4c   : > { %1877 = vmatmul.mubr.bf16.gmra.mrb[16].mxu1 %v2518_v44  ;;  %v383_v36 = vsel %vm3324_vm4, %v378_v31, %v382_v1  ;;  %v2519_v44 = vcombine.low %v459_v33, %v462_v46  ;;  %v3636_v1 = vld [vmem:[%s3290_s27 + $0x18] sm:$0xf]  ;;  %v504_v11 = vrot.slane %v502_v61, 5  ;;  %v653_v16 = vsel %vm3334_vm5, %v2466_v62, %v652_v2  ;;  %v2455_v31 = vld [vmem:[%s3290_s27 + $0x20] sm:$0x1] }
  0x4d   : > { %1884 = vmatprep.mubr.bf16.mxu1 %v2525_v19  ;;  %v2513_v41 = vcombine.low %v383_v36, %v393_v39  ;;  %v712_v58 = vshrl.u32 %v3636_v1, 16  ;;  %v715_v6 = vshll.u32 %v3636_v1, 16  ;;  %v656_v18 = vsel %vm3334_vm5, %v3456_v45, %v655_v63  ;;  %v2461_v46 = vld [vmem:[%s3290_s27 + $0x18] sm:$0xe]  ;;  %v3680_v39 = vld [vmem:[%s3290_s27 + $0x24] sm:$0xf] }
  0x4e   : > { %v721_v19 = vshll.u32 %v3644_v37, 16  ;;  %v2532_v21 = vcombine.low %v653_v16, %v656_v18  ;;  %v725_v43 = vshrl.u32 %v3644_v37, 16  ;;  %v731_v2 = vshll.u32 %v3647_v5, 16 }
  0x4f   : > { %1803 = vmatprep.mubr.bf16.mxu0 %v2513_v41  ;;  %v714_v22 = vrot.slane %v712_v58, 4  ;;  %v717_v29 = vrot.slane %v715_v6, 5  ;;  %v505_v45 = vsel %vm3324_vm4, %v3368_v20, %v504_v11  ;;  %v585_v32 = vor.u32 %v3538_v17, %v3528_v7  ;;  %v3685_v41 = vld [vmem:[%s3290_s27 + $0x28] sm:$0xf] }
  0x50   : > { %v723_v30 = vrot.slane %v721_v19, 5  ;;  %v727_v34 = vrot.slane %v725_v43, 4  ;;  %v2526_v35 = vcombine.low %v495_v57, %v505_v45  ;;  %v662_v36 = vrot.slane %v2455_v31, 5 }
  0x51   : > { %v718_v33 = vor.u32 %v717_v29, %v714_v22  ;;  %v2538_v20 = vcombine.low %v3636_v1, %v3644_v37  ;;  %v2467_v47 = vrot.slane %v2461_v46, 9  ;;  %v609_v51 = vor.u32 %v3595_v28, %v3593_v25  ;;  %v3707_v22 = vld [vmem:[%s3290_s27 + $0x2c] sm:$0x1]  ;;  %v2462_v29 = vld [vmem:[%s3290_s27 + $0x24] sm:$0xe] }
  0x52   : > { %v728_v53 = vor.u32 %v727_v34, %v723_v30  ;;  %v663_v57 = vsel %vm3334_vm5, %v661_v38, %v662_v36  ;;  %v736_v61 = vshrl.u32 %v3680_v39, 16  ;;  %v739_v63 = vshll.u32 %v3680_v39, 16  ;;  %v3722_v34 = vld [vmem:[%s3290_s27 + $0x30] sm:$0xf] }
  0x53   : > { %1804 = vmatmul.mubr.bf16.gmra.mrb[20].mxu0 %v2507_v42  ;;  %v3676_v42 = vld [vmem:[%s4129_s1 + $0x208] sm:$0xff]   ;;  %v719_v52 = vrot.slane %v718_v33, 4  ;;  %v660_v62 = vsel %vm3334_vm5, %v2467_v47, %v659_v40  ;;  %v745_v1 = vshll.u32 %v3685_v41, 16  ;;  %v749_v58 = vshrl.u32 %v3685_v41, 16  ;;  %v3719_v33 = vld [vmem:[%s4129_s1 + $0x210] sm:$0xff]  }
  0x54   : > { %1885 = vmatmul.mubr.bf16.gmra.mrb[20].mxu1 %v2519_v44  ;;  %1925 = vmatprep.mubr.bf16.mxu0 %v2532_v21  ;;  %v733_v44 = vrot.slane %v731_v2, 5  ;;  %v729_v11 = vrot.slane %v728_v53, 4  ;;  %v2533_v38 = vcombine.low %v660_v62, %v663_v57  ;;  %v738_v16 = vrot.slane %v736_v61, 4  ;;  %v3733_v62 = vld [vmem:[%s3290_s27 + $0x34] sm:$0xf] }
  0x55   : > { %v724_v6 = vsel %vm3324_vm4, %v719_v52, %v723_v30  ;;  %v741_v18 = vrot.slane %v739_v63, 5  ;;  %v747_v19 = vrot.slane %v745_v1, 5  ;;  %v751_v21 = vrot.slane %v749_v58, 4  ;;  %v3742_v1 = vld [vmem:[%s4129_s1 + $0x218] sm:$0xff]  }
  0x56   : > { %v755_v40 = vshll.u32 %v3688_v49, 16  ;;  %v734_v43 = vsel %vm3324_vm4, %v729_v11, %v733_v44  ;;  %v891_v30 = vrot.slane %v3688_v49, 5  ;;  %v518_v2 = vrot.slane %v516_v50, 5 }
  0x57   : > { %v526_v45 = vshll.u32 %v2455_v31, 16  ;;  %v742_v46 = vor.u32 %v741_v18, %v738_v16  ;;  %v752_v36 = vor.u32 %v751_v21, %v747_v19  ;;  %v2539_v31 = vcombine.low %v3680_v39, %v3685_v41 }
  0x58   : > { %v757_v44 = vrot.slane %v755_v40, 5  ;;  %v519_v47 = vsel %vm3324_vm4, %v3575_v48, %v518_v2  ;;  %v523_v23 = vor.u32 %v3629_v56, %v518_v2  ;;  %v2468_v57 = vrot.slane %v2462_v29, 9 }
  0x59   : > { %v528_v50 = vrot.slane %v526_v45, 5  ;;  %v743_v52 = vrot.slane %v742_v46, 4  ;;  %v753_v53 = vrot.slane %v752_v36, 4  ;;  %v666_v61 = vrot.slane %v3428_v13, 5  ;;  %v3768_v45 = vld [vmem:[%s3290_s27 + $0x38] sm:$0x1] }
  0x5a   : > { %v524_v63 = vrot.slane %v523_v23, 4  ;;  %v669_v48 = vrot.slane %v3707_v22, 5  ;;  %v760_v56 = vshrl.u32 %v3722_v34, 16  ;;  %v763_v39 = vshll.u32 %v3722_v34, 16  ;;  %v3777_v23 = vld [vmem:[%s3290_s27 + $0x3c] sm:$0xf] }
  0x5b   : > { %1926 = vmatmul.mubr.bf16.vlgmr.msra.gmra.mrb[24].mxu0 %v2526_v35  ;;  %v2544_v35 = vcombine.low %v724_v6, %v734_v43  ;;  %v748_v58 = vsel %vm3324_vm4, %v743_v52, %v747_v19  ;;  %v667_v6 = vsel %vm3334_vm5, %v2468_v57, %v666_v61  ;;  %v668_v11 = vrot.slane %v666_v61, 4  ;;  %v3784_v61 = vld [vmem:[%s3290_s27 + $0x40] sm:$0xf] }
  0x5c   : > { %2913 = vmatpush3.bf16.msra.mxu0 %v3641_v4  ;;  %1933 = vmatprep.mubr.bf16.mxu0 %v2533_v38  ;;  %v3752_v38 = vld [vmem:[%s3290_s27 + $0x38] sm:$0x1]  ;;  %v529_v18 = vsel %vm3324_vm4, %v524_v63, %v528_v50  ;;  %v762_v19 = vrot.slane %v760_v56, 4  ;;  %v765_v21 = vrot.slane %v763_v39, 5  ;;  %v769_v43 = vshll.u32 %v3733_v62, 16 }
  0x5d   : > { %2914 = vmatprep.subr.bf16.mxu0 %v3676_v42  ;;  %2006 = vmatprep.mubr.bf16.mxu1 %v2544_v35  ;;  %v2527_v40 = vcombine.low %v519_v47, %v529_v18  ;;  %v670_v29 = vsel %vm3334_vm5, %v668_v11, %v669_v48  ;;  %v773_v2 = vshrl.u32 %v3733_v62, 16  ;;  %v779_v36 = vshll.u32 %v3752_v38, 16  ;;  %v2463_v47 = vld [vmem:[%s3290_s27 + $0x30] sm:$0xe]  ;;  %v3791_v48 = vld [vmem:[%s3290_s27 + $0x44] sm:$0x1] }
  0x5e   : > { %2007 = vmatmul.mubr.bf16.vlgmr.msra.gmra.mrb[24].mxu1 %v2538_v20  ;;  %v758_v20 = vsel %vm3324_vm4, %v753_v53, %v757_v44  ;;  %v2534_v35 = vcombine.low %v667_v6, %v670_v29  ;;  %v766_v46 = vor.u32 %v765_v21, %v762_v19  ;;  %v538_v44 = vrot.slane %v537_v9, 4 }
  0x5f   : > { %2948 = vmatpush3.bf16.msra.mxu1 %v3641_v4  ;;  %v2545_v16 = vcombine.low %v748_v58, %v758_v20  ;;  %v3760_v4 = vld [vmem:[%s4129_s1 + $0x220] sm:$0xff]   ;;  %v771_v50 = vrot.slane %v769_v43, 5  ;;  %v775_v52 = vrot.slane %v773_v2, 4  ;;  %v540_v53 = vshll.u32 %v3428_v13, 16  ;;  %v3803_v20 = vld [vmem:[%s4129_s1 + $0x228] sm:$0xff]  }
  0x60   : > { %2915 = vmatpush3.bf16.msra.mxu0 %v3676_v42  ;;  %2941 = vmatprep.subr.bf16.mxu1 %v3676_v42  ;;  %v546_v57 = vrot.slane %v544_v24, 4  ;;  %v767_v26 = vrot.slane %v766_v46, 4  ;;  %v781_v27 = vrot.slane %v779_v36, 5  ;;  %v550_v9 = vshll.u32 %v3707_v22, 16 }
  0x61   : > { %2916 = vmatprep.subr.bf16.mxu0 %v3719_v33  ;;  %2014 = vmatprep.mubr.bf16.mxu1 %v2545_v16  ;;  %v2540_v63 = vcombine.low %v3722_v34, %v3733_v62  ;;  %v542_v56 = vrot.slane %v540_v53, 5  ;;  %v2469_v13 = vrot.slane %v2463_v47, 9  ;;  %v673_v24 = vrot.slane %v3475_v60, 5 }
  0x62   : > { %v772_v39 = vsel %vm3324_vm4, %v767_v26, %v771_v50  ;;  %v552_v58 = vrot.slane %v550_v9, 5  ;;  %v676_v22 = vrot.slane %v3768_v45, 5  ;;  %v784_v34 = vshrl.u32 %v3777_v23, 16 }
  0x63   : > { %1934 = vmatmul.mubr.bf16.gmra.mrb[28].mxu0 %v2527_v40  ;;  %2949 = vmatpush3.bf16.msra.mxu1 %v3676_v42  ;;  %v776_v42 = vor.u32 %v775_v52, %v771_v50  ;;  %v543_v11 = vsel %vm3324_vm4, %v538_v44, %v542_v56  ;;  %v674_v16 = vsel %vm3334_vm5, %v2469_v13, %v673_v24  ;;  %v675_v18 = vrot.slane %v673_v24, 4  ;;  %v3836_v13 = vld [vmem:[%s4129_s1 + $0x230] sm:$0xff]  }
  0x64   : > { %2917 = vmatpush3.bf16.msra.mxu0 %v3719_v33  ;;  %1941 = vmatprep.mubr.bf16.mxu0 %v2534_v35  ;;  %v786_v19 = vrot.slane %v784_v34, 4  ;;  %v787_v21 = vshll.u32 %v3777_v23, 16  ;;  %v793_v40 = vshll.u32 %v3784_v61, 16  ;;  %v797_v2 = vshrl.u32 %v3784_v61, 16 }
  0x65   : > { %2918 = vmatprep.subr.bf16.mxu0 %v3742_v1  ;;  %2942 = vmatprep.subr.bf16.mxu1 %v3719_v33  ;;  %v777_v6 = vrot.slane %v776_v42, 4  ;;  %v677_v46 = vsel %vm3334_vm5, %v675_v18, %v676_v22  ;;  %v905_v9 = vrot.slane %v3791_v48, 5  ;;  %v562_v42 = vrot.slane %v561_v10, 4 }
  0x66   : > { %2015 = vmatmul.mubr.bf16.gmra.mrb[28].mxu1 %v2539_v31  ;;  %v547_v31 = vor.u32 %v546_v57, %v542_v56  ;;  %v789_v36 = vrot.slane %v787_v21, 5  ;;  %v795_v44 = vrot.slane %v793_v40, 5  ;;  %v2535_v50 = vcombine.low %v674_v16, %v677_v46  ;;  %v2464_v57 = vld [vmem:[%s3290_s27 + $0x3c] sm:$0xe]  ;;  %v3830_v56 = vld [vmem:[%s3290_s27 + $0x44] sm:$0x1] }
  0x67   : > { %2950 = vmatpush3.bf16.msra.mxu1 %v3719_v33  ;;  %v782_v29 = vsel %vm3324_vm4, %v777_v6, %v781_v27  ;;  %v803_v33 = vshll.u32 %v3791_v48, 16  ;;  %v799_v52 = vrot.slane %v797_v2, 4  ;;  %v564_v24 = vshll.u32 %v3475_v60, 16  ;;  %v3852_v60 = vld [vmem:[%s4129_s1 + $0x238] sm:$0xff]   ;;  %v3871_v40 = vld [vmem:[%s3290_s27 + $0x50] sm:$0x1] }
  0x68   : > { %2919 = vmatpush3.bf16.msra.mxu0 %v3742_v1  ;;  %2943 = vmatprep.subr.bf16.mxu1 %v3742_v1  ;;  %v548_v43 = vrot.slane %v547_v31, 4  ;;  %v2546_v35 = vcombine.low %v772_v39, %v782_v29  ;;  %v790_v27 = vor.u32 %v789_v36, %v786_v19  ;;  %v570_v39 = vrot.slane %v568_v8, 4 }
  0x69   : > { %2920 = vmatprep.subr.bf16.mxu0 %v3760_v4  ;;  %v805_v53 = vrot.slane %v803_v33, 5  ;;  %v2541_v10 = vcombine.low %v3777_v23, %v3784_v61  ;;  %v2470_v22 = vrot.slane %v2464_v57, 9  ;;  %v680_v34 = vrot.slane %v3525_v54, 5 }
  0x6a   : > { %v553_v47 = vsel %vm3324_vm4, %v548_v43, %v552_v58  ;;  %2022 = vmatprep.mubr.bf16.mxu1 %v2546_v35  ;;  %v574_v58 = vshll.u32 %v3768_v45, 16  ;;  %v791_v15 = vrot.slane %v790_v27, 4  ;;  %v566_v45 = vrot.slane %v564_v24, 5  ;;  %v2459_v24 = vld [vmem:[%s3290_s27 + $0x50] sm:$0x1] }
  0x6b   : > { %2951 = vmatpush3.bf16.msra.mxu1 %v3742_v1  ;;  %v2528_v26 = vcombine.low %v543_v11, %v553_v47  ;;  %v800_v1 = vor.u32 %v799_v52, %v795_v44  ;;  %v683_v11 = vrot.slane %v3830_v56, 5  ;;  %v681_v31 = vsel %vm3334_vm5, %v2470_v22, %v680_v34 }
  0x6c   : > { %2921 = vmatpush3.bf16.msra.mxu0 %v3760_v4  ;;  %2944 = vmatprep.subr.bf16.mxu1 %v3760_v4  ;;  %v576_v6 = vrot.slane %v574_v58, 5  ;;  %v796_v23 = vsel %vm3324_vm4, %v791_v15, %v795_v44  ;;  %v682_v16 = vrot.slane %v680_v34, 4  ;;  %v808_v18 = vshrl.u32 %v3843_v12, 16  ;;  %v3896_v58 = vld [vmem:[%s3290_s27 + $0x54] sm:$0xf] }
  0x6d   : > { %2922 = vmatprep.subr.bf16.mxu0 %v3803_v20  ;;  %1942 = vmatmul.mubr.bf16.gmra.mrb[32].mxu0 %v2528_v26  ;;  %v801_v8 = vrot.slane %v800_v1, 4  ;;  %v567_v21 = vsel %vm3324_vm4, %v562_v42, %v566_v45  ;;  %v811_v29 = vshll.u32 %v3843_v12, 16  ;;  %v827_v52 = vshll.u32 %v3871_v40, 16  ;;  %v2465_v26 = vld [vmem:[%s3290_s27 + $0x48] sm:$0xe] }
  0x6e   : > { %2023 = vmatmul.mubr.bf16.gmra.mrb[32].mxu1 %v2540_v63  ;;  %1949 = vmatprep.mubr.bf16.mxu0 %v2535_v50  ;;  %v3856_v63 = vld [vmem:[%s3290_s27 + $0x4c] sm:$0xf]  ;;  %v684_v2 = vsel %vm3334_vm5, %v682_v16, %v683_v11  ;;  %v810_v33 = vrot.slane %v808_v18, 4  ;;  %v588_v57 = vshll.u32 %v3525_v54, 16  ;;  %v690_v11 = vrot.slane %v2459_v24, 5 }
  0x6f   : > { %2952 = vmatpush3.bf16.msra.mxu1 %v3760_v4  ;;  %v806_v19 = vsel %vm3324_vm4, %v801_v8, %v805_v53  ;;  %v571_v4 = vor.u32 %v570_v39, %v566_v45  ;;  %v817_v35 = vshll.u32 %v3856_v63, 16  ;;  %v2536_v36 = vcombine.low %v681_v31, %v684_v2 }
  0x70   : > { %2923 = vmatpush3.bf16.msra.mxu0 %v3803_v20  ;;  %2945 = vmatprep.subr.bf16.mxu1 %v3803_v20  ;;  %v2547_v43 = vcombine.low %v796_v23, %v806_v19  ;;  %v813_v44 = vrot.slane %v811_v29, 5  ;;  %v821_v47 = vshrl.u32 %v3856_v63, 16  ;;  %v586_v53 = vrot.slane %v585_v32, 4 }
  0x71   : > { %2924 = vmatprep.subr.bf16.mxu0 %v3836_v13  ;;  %v572_v46 = vrot.slane %v571_v4, 4  ;;  %v819_v50 = vrot.slane %v817_v35, 5  ;;  %v829_v7 = vrot.slane %v827_v52, 5  ;;  %v590_v17 = vrot.slane %v588_v57, 5  ;;  %v2490_v52 = vld [vmem:[%s3290_s27 + $0x18] sm:$0xe] }
  0x72   : > { %2030 = vmatprep.mubr.bf16.mxu1 %v2547_v43  ;;  %v814_v42 = vor.u32 %v813_v44, %v810_v33  ;;  %v823_v1 = vrot.slane %v821_v47, 4  ;;  %v598_v32 = vshll.u32 %v3830_v56, 16  ;;  %v2542_v34 = vcombine.low %v3843_v12, %v3856_v63  ;;  %v3905_v56 = vld [vmem:[%s3290_s27 + $0x58] sm:$0xf] }
  0x73   : > { %2953 = vmatpush3.bf16.msra.mxu1 %v3803_v20  ;;  %v577_v27 = vsel %vm3324_vm4, %v572_v46, %v576_v6  ;;  %v594_v20 = vrot.slane %v592_v3, 4  ;;  %v2471_v8 = vrot.slane %v2465_v26, 9  ;;  %v591_v54 = vsel %vm3324_vm4, %v586_v53, %v590_v17 }
  0x74   : > { %2925 = vmatpush3.bf16.msra.mxu0 %v3836_v13  ;;  %2946 = vmatprep.subr.bf16.mxu1 %v3836_v13  ;;  %v2529_v39 = vcombine.low %v567_v21, %v577_v27  ;;  %v815_v15 = vrot.slane %v814_v42, 4  ;;  %v824_v22 = vor.u32 %v823_v1, %v819_v50  ;;  %v687_v45 = vrot.slane %v3584_v59, 5  ;;  %v3917_v21 = vld [vmem:[%s3290_s27 + $0x5c] sm:$0x1] }
  0x75   : > { %2926 = vmatprep.subr.bf16.mxu0 %v3852_v60  ;;  %v595_v3 = vor.u32 %v594_v20, %v590_v17  ;;  %v835_v18 = vshll.u32 %v3896_v58, 16  ;;  %v841_v29 = vshll.u32 %v3905_v56, 16  ;;  %v845_v43 = vshrl.u32 %v3905_v56, 16 }
  0x76   : > { %2031 = vmatmul.mubr.bf16.gmra.mrb[36].mxu1 %v2541_v10  ;;  %1950 = vmatmul.mubr.bf16.gmra.mrb[36].mxu0 %v2529_v39  ;;  %v600_v10 = vrot.slane %v598_v32, 5  ;;  %v820_v12 = vsel %vm3324_vm4, %v815_v15, %v819_v50  ;;  %v825_v6 = vrot.slane %v824_v22, 4  ;;  %v688_v31 = vsel %vm3334_vm5, %v2471_v8, %v687_v45  ;;  %v2492_v39 = vld [vmem:[%s3290_s27 + $0x30] sm:$0xe] }
  0x77   : > { %2954 = vmatpush3.bf16.msra.mxu1 %v3836_v13  ;;  %1957 = vmatprep.mubr.bf16.mxu0 %v2536_v36  ;;  %v832_v13 = vshrl.u32 %v3896_v58, 16  ;;  %v596_v23 = vrot.slane %v595_v3, 4  ;;  %v689_v16 = vrot.slane %v687_v45, 4  ;;  %v837_v46 = vrot.slane %v835_v18, 5 }
  0x78   : > { %2927 = vmatpush3.bf16.msra.mxu0 %v3852_v60  ;;  %2947 = vmatprep.subr.bf16.mxu1 %v3852_v60  ;;  %v830_v19 = vsel %vm3324_vm4, %v825_v6, %v829_v7  ;;  %v843_v47 = vrot.slane %v841_v29, 5  ;;  %v847_v50 = vrot.slane %v845_v43, 4  ;;  %v851_v57 = vshll.u32 %v3917_v21, 16 }
  0x79   : > { %v834_v4 = vrot.slane %v832_v13, 4  ;;  %v2548_v2 = vcombine.low %v820_v12, %v830_v19  ;;  %v601_v33 = vsel %vm3324_vm4, %v596_v23, %v600_v10  ;;  %v691_v35 = vsel %vm3334_vm5, %v689_v16, %v690_v11  ;;  %v2494_v16 = vld [vmem:[%s3290_s27 + $0x48] sm:$0xe] }
  0x7a   : > { %v2530_v36 = vcombine.low %v591_v54, %v601_v33  ;;  %v2537_v44 = vcombine.low %v688_v31, %v691_v35  ;;  %v612_v26 = vshll.u32 %v3584_v59, 16  ;;  %v848_v27 = vor.u32 %v847_v50, %v843_v47  ;;  %v2491_v59 = vld [vmem:[%s3290_s27 + $0x24] sm:$0xe] }
  0x7b   : > { %2955 = vmatpush3.bf16.msra.mxu1 %v3852_v60  ;;  %2038 = vmatprep.mubr.bf16.mxu1 %v2548_v2  ;;  %v838_v53 = vor.u32 %v837_v46, %v834_v4  ;;  %v610_v60 = vrot.slane %v609_v51, 4  ;;  %v618_v42 = vrot.slane %v616_v14, 4  ;;  %v622_v1 = vshll.u32 %v2459_v24, 16 }
  0x7c   : > { %v2543_v20 = vcombine.low %v3896_v58, %v3905_v56  ;;  %v853_v17 = vrot.slane %v851_v57, 5  ;;  %v614_v32 = vrot.slane %v612_v26, 5  ;;  %v2496_v25 = vrot.slane %v2490_v52, 9 }
  0x7d   : > { %v839_v7 = vrot.slane %v838_v53, 4  ;;  %v849_v28 = vrot.slane %v848_v27, 4  ;;  %v624_v51 = vrot.slane %v622_v1, 5  ;;  %v881_v15 = vrot.slane %v3644_v37, 5 }
  0x7e   : > { %2039 = vmatmul.mubr.bf16.gmra.mrb[40].mxu1 %v2542_v34  ;;  %1958 = vmatmul.mubr.bf16.gmra.mrb[40].mxu0 %v2530_v36  ;;  %v884_v22 = vrot.slane %v3647_v5, 5  ;;  %v615_v24 = vsel %vm3324_vm4, %v610_v60, %v614_v32  ;;  %v619_v58 = vor.u32 %v618_v42, %v614_v32  ;;  %v2498_v34 = vrot.slane %v2492_v39, 9  ;;  %v2493_v5 = vld [vmem:[%s3290_s27 + $0x3c] sm:$0xe]  ;;  %v2495_v36 = vld [vmem:[%s3290_s27 + $0x54] sm:$0xe] }
  0x7f   : > { %1965 = vmatprep.mubr.bf16.mxu0 %v2537_v44  ;;  %v844_v14 = vsel %vm3324_vm4, %v839_v7, %v843_v47  ;;  %v854_v8 = vsel %vm3324_vm4, %v849_v28, %v853_v17  ;;  %v882_v54 = vsel %vm3334_vm5, %v2496_v25, %v881_v15  ;;  %v883_v3 = vrot.slane %v881_v15, 4  ;;  %s2960_s27 = smul.u32 3, %s4147_s13 }
  0x80   : > { %v895_v37 = vrot.slane %v3733_v62, 5  ;;  %v2549_v10 = vcombine.low %v844_v14, %v854_v8  ;;  %v620_v45 = vrot.slane %v619_v58, 4  ;;  %v898_v12 = vrot.slane %v3752_v38, 5 }
  0x81   : > { %v2497_v6 = vrot.slane %v2491_v59, 9  ;;  %v885_v11 = vsel %vm3334_vm5, %v883_v3, %v884_v22  ;;  %v888_v31 = vrot.slane %v3685_v41, 5  ;;  %v2499_v19 = vrot.slane %v2493_v5, 9  ;;  %s225_s11 = sadd.s32 %s2960_s27, %s3241_s4  ;;  %s217_s4 = sadd.s32 %s2959_s30, %s2958_s28 }
  0x82   : > { %v896_v13 = vsel %vm3334_vm5, %v2498_v34, %v895_v37  ;;  %v897_v23 = vrot.slane %v895_v37, 4  ;;  %2046 = vmatprep.mubr.bf16.mxu1 %v2549_v10  ;;  %v625_v62 = vsel %vm3324_vm4, %v620_v45, %v624_v51  ;;  %v2550_v18 = vcombine.low %v882_v54, %v885_v11  ;;  %s2435_s21 = sshll.u32 %s225_s11, 3  ;;  %s2434_s13 = sshll.u32 %s217_s4, 2 }
  0x83   : > { %v902_v38 = vrot.slane %v3784_v61, 5  ;;  %v2531_v4 = vcombine.low %v615_v24, %v625_v62  ;;  %v890_v43 = vrot.slane %v888_v31, 4  ;;  %v2500_v35 = vrot.slane %v2494_v16, 9  ;;  %s4004_s25 = scalar_lea.vmem %s4131_s3, %s2435_s21  ;;  %s4070_s7 = scalar_lea.vmem %s4130_s2, %s2434_s13 }
  0x84   : > { %v899_v29 = vsel %vm3334_vm5, %v897_v23, %v898_v12  ;;  %v909_v55 = vrot.slane %v3856_v63, 5  ;;  %v912_v46 = vrot.slane %v3871_v40, 5  ;;  %v889_v61 = vsel %vm3334_vm5, %v2497_v6, %v888_v31 }
  0x85   : > { %v2552_v2 = vcombine.low %v896_v13, %v899_v29  ;;  %v903_v41 = vsel %vm3334_vm5, %v2499_v19, %v902_v38  ;;  %v904_v33 = vrot.slane %v902_v38, 4  ;;  %v892_v44 = vsel %vm3334_vm5, %v890_v43, %v891_v30 }
  0x86   : > { %2047 = vmatmul.mubr.bf16.gmra.mrb[44].mxu1 %v2543_v20  ;;  %1966 = vmatmul.mubr.bf16.gmra.mrb[44].mxu0 %v2531_v4  ;;  %v916_v63 = vrot.slane %v3905_v56, 5  ;;  %v910_v40 = vsel %vm3334_vm5, %v2500_v35, %v909_v55  ;;  %v911_v52 = vrot.slane %v909_v55, 4  ;;  %v2501_v53 = vrot.slane %v2495_v36, 9 }
  0x87   : > { %2928 = vmatprep.mubr.bf16.mxu0 %v2550_v18  ;;  %2932 = vmatprep.mubr.bf16.mxu1 %v2552_v2  ;;  %v906_v47 = vsel %vm3334_vm5, %v904_v33, %v905_v9  ;;  %v919_v60 = vrot.slane %v3917_v21, 5  ;;  %v2551_v49 = vcombine.low %v889_v61, %v892_v44  ;;  %v3132_v61 = vmov 0.0  }
  0x88   : > { %v2553_v50 = vcombine.low %v903_v41, %v906_v47  ;;  %v918_v57 = vrot.slane %v916_v63, 4  ;;  %v913_v30 = vsel %vm3334_vm5, %v911_v52, %v912_v46  ;;  %v917_v48 = vsel %vm3334_vm5, %v2501_v53, %v916_v63  ;;  %2285 = vst [vmem:[%s4004_s25 + $0x2] sm:$0x3f] %v3132_v61 }
  0x89   : > { %v2554_v26 = vcombine.low %v910_v40, %v913_v30 }
  0x8a   : > { %v920_v9 = vsel %vm3334_vm5, %v918_v57, %v919_v60 }
  0x8b   : > { %v2555_v56 = vcombine.low %v917_v48, %v920_v9 }
  0x8e   : > { %2933 = vmatmul.mubr.bf16.vlgmr.msra.gmra.mrb[48].mxu1 %v2553_v50  ;;  %2929 = vmatmul.mubr.bf16.vlgmr.msra.gmra.mrb[48].mxu0 %v2551_v49 }
  0x8f   : > { %2936 = vmatprep.mubr.bf16.mxu1 %v2554_v26 }
  0x96   : > { %2937 = vmatmul.mubr.bf16.gmra.mrb[52].mxu1 %v2555_v56 }
  0xfe   : > { %v2706_v27 = vpop.f32.mrb[0].mxu0 }
  0xff   : > { %v2758_v42 = vpop.f32.mrb[0].mxu1  ;;  %v2707_v1 = vpop.f32.mrb[1].mxu0 }
 0x100   : > { %v2708_v21 = vadd.f32 %v2707_v1, %v2706_v27  ;;  %v2759_v20 = vpop.f32.mrb[1].mxu1  ;;  %v2709_v39 = vpop.f32.mrb[2].mxu0 }
 0x101   : > { %v2760_v7 = vadd.f32 %v2759_v20, %v2758_v42  ;;  %v2761_v17 = vpop.f32.mrb[2].mxu1  ;;  %v2710_v32 = vpop.f32.mrb[3].mxu0 }
 0x102   : > { %v2711_v25 = vadd.f32 %v2710_v32, %v2709_v39  ;;  %v2762_v28 = vpop.f32.mrb[3].mxu1 }
 0x103   : > { %v3987_v51 = vadd.f32 %v2760_v7, %v2708_v21  ;;  %v2763_v15 = vadd.f32 %v2762_v28, %v2761_v17 }
 0x105   : > { %v3989_v22 = vadd.f32 %v2763_v15, %v2711_v25 }
 0x106   : > { %v2712_v0 = vpop.f32.mrb[4].mxu0 }
 0x107   : > { %v2764_v59 = vpop.f32.mrb[4].mxu1  ;;  %v2713_v14 = vpop.f32.mrb[5].mxu0 }
 0x108   : > { %v2765_v24 = vpop.f32.mrb[5].mxu1  ;;  %v2714_v58 = vadd.f32 %v2713_v14, %v2712_v0  ;;  %v2715_v8 = vpop.f32.mrb[6].mxu0 }
 0x109   : > { %v2766_v34 = vadd.f32 %v2765_v24, %v2764_v59  ;;  %v2767_v54 = vpop.f32.mrb[6].mxu1  ;;  %v2716_v3 = vpop.f32.mrb[7].mxu0 }
 0x10a   : > { %v2768_v37 = vpop.f32.mrb[7].mxu1  ;;  %v2717_v10 = vadd.f32 %v2716_v3, %v2715_v8 }
 0x10b   : > { %v3991_v5 = vadd.f32 %v2766_v34, %v2714_v58  ;;  %v2769_v45 = vadd.f32 %v2768_v37, %v2767_v54 }
 0x10d   : > { %v3993_v12 = vadd.f32 %v2769_v45, %v2717_v10 }
 0x10e   : > { %v2718_v11 = vpop.f32.mrb[8].mxu0 }
 0x10f   : > { %v2770_v6 = vpop.f32.mrb[8].mxu1  ;;  %v2719_v23 = vpop.f32.mrb[9].mxu0 }
 0x110   : > { %v2771_v13 = vpop.f32.mrb[9].mxu1  ;;  %v2720_v62 = vadd.f32 %v2719_v23, %v2718_v11  ;;  %v2721_v18 = vpop.f32.mrb[10].mxu0 }
 0x111   : > { %v2772_v31 = vadd.f32 %v2771_v13, %v2770_v6  ;;  %v2773_v16 = vpop.f32.mrb[10].mxu1  ;;  %v2722_v38 = vpop.f32.mrb[11].mxu0 }
 0x112   : > { %v2774_v19 = vpop.f32.mrb[11].mxu1  ;;  %v2723_v43 = vadd.f32 %v2722_v38, %v2721_v18 }
 0x113   : > { %v2775_v4 = vadd.f32 %v2774_v19, %v2773_v16  ;;  %v3996_v29 = vadd.f32 %v2772_v31, %v2720_v62 }
 0x115   : > { %v3999_v2 = vadd.f32 %v2775_v4, %v2723_v43 }
 0x116   : > { %v2724_v33 = vpop.f32.mrb[12].mxu0 }
 0x117   : > { %v2776_v41 = vpop.f32.mrb[12].mxu1  ;;  %v2725_v55 = vpop.f32.mrb[13].mxu0 }
 0x118   : > { %v2777_v35 = vpop.f32.mrb[13].mxu1  ;;  %v2726_v44 = vadd.f32 %v2725_v55, %v2724_v33  ;;  %v2727_v47 = vpop.f32.mrb[14].mxu0 }
 0x119   : > { %v2778_v46 = vadd.f32 %v2777_v35, %v2776_v41  ;;  %v2779_v36 = vpop.f32.mrb[14].mxu1  ;;  %v2728_v50 = vpop.f32.mrb[15].mxu0 }
 0x11a   : > { %v2780_v63 = vpop.f32.mrb[15].mxu1  ;;  %v2729_v53 = vadd.f32 %v2728_v50, %v2727_v47 }
 0x11b   : > { %v2781_v40 = vadd.f32 %v2780_v63, %v2779_v36  ;;  %v4007_v52 = vadd.f32 %v2778_v46, %v2726_v44 }
 0x11d   : > { %v4009_v57 = vadd.f32 %v2781_v40, %v2729_v53 }
 0x11e   : > { %v2730_v60 = vpop.f32.mrb[16].mxu0 }
 0x11f   : > { %v2782_v49 = vpop.f32.mrb[16].mxu1  ;;  %v2731_v30 = vpop.f32.mrb[17].mxu0 }
 0x120   : > { %v2783_v26 = vpop.f32.mrb[17].mxu1  ;;  %v2732_v48 = vadd.f32 %v2731_v30, %v2730_v60  ;;  %v2733_v56 = vpop.f32.mrb[18].mxu0 }
 0x121   : > { %v2784_v9 = vadd.f32 %v2783_v26, %v2782_v49  ;;  %v2785_v27 = vpop.f32.mrb[18].mxu1  ;;  %v2734_v42 = vpop.f32.mrb[19].mxu0 }
 0x122   : > { %v2786_v1 = vpop.f32.mrb[19].mxu1  ;;  %v2735_v20 = vadd.f32 %v2734_v42, %v2733_v56 }
 0x123   : > { %v4011_v21 = vadd.f32 %v2784_v9, %v2732_v48  ;;  %v2787_v39 = vadd.f32 %v2786_v1, %v2785_v27 }
 0x125   : > { %v4013_v7 = vadd.f32 %v2787_v39, %v2735_v20 }
 0x126   : > { %v2736_v25 = vpop.f32.mrb[20].mxu0 }
 0x127   : > { %v2788_v17 = vpop.f32.mrb[20].mxu1  ;;  %v2737_v0 = vpop.f32.mrb[21].mxu0 }
 0x128   : > { %v2789_v32 = vpop.f32.mrb[21].mxu1  ;;  %v2738_v14 = vadd.f32 %v2737_v0, %v2736_v25  ;;  %v2739_v24 = vpop.f32.mrb[22].mxu0 }
 0x129   : > { %v2790_v28 = vadd.f32 %v2789_v32, %v2788_v17  ;;  %v2791_v15 = vpop.f32.mrb[22].mxu1  ;;  %v2740_v34 = vpop.f32.mrb[23].mxu0 }
 0x12a   : > { %v2792_v59 = vpop.f32.mrb[23].mxu1  ;;  %v2741_v54 = vadd.f32 %v2740_v34, %v2739_v24 }
 0x12b   : > { %v2793_v58 = vadd.f32 %v2792_v59, %v2791_v15  ;;  %v4015_v8 = vadd.f32 %v2790_v28, %v2738_v14 }
 0x12d   : > { %v4017_v3 = vadd.f32 %v2793_v58, %v2741_v54 }
 0x12e   : > { %v2810_v37 = vpop.f32.mrb[24].mxu0 }
 0x12f   : > { %v2811_v10 = vpop.f32.mrb[25].mxu0 }
 0x130   : > { %v2812_v45 = vadd.f32 %v2811_v10, %v2810_v37  ;;  %v2813_v6 = vpop.f32.mrb[26].mxu0 }
 0x131   : > { %v2814_v11 = vpop.f32.mrb[27].mxu0  ;;  %v2862_v31 = vpop.f32.mrb[24].mxu1 }
 0x132   : > { %v1928_v13 = vadd.f32 %v2812_v45, %v3987_v51  ;;  %v2815_v23 = vadd.f32 %v2814_v11, %v2813_v6  ;;  %v2863_v62 = vpop.f32.mrb[25].mxu1 }
 0x133   : > { %v2864_v18 = vadd.f32 %v2863_v62, %v2862_v31  ;;  %v2865_v19 = vpop.f32.mrb[26].mxu1 }
 0x134   : > { %v1931_v16 = vadd.f32 %v2815_v23, %v3989_v22  ;;  %v2866_v38 = vpop.f32.mrb[27].mxu1 }
 0x135   : > { %v2867_v4 = vadd.f32 %v2866_v38, %v2865_v19  ;;  %v4021_v43 = vadd.f32 %v2864_v18, %v1928_v13 }
 0x136   : > { %v2816_v41 = vpop.f32.mrb[28].mxu0 }
 0x137   : > { %v2817_v33 = vpop.f32.mrb[29].mxu0  ;;  %v4023_v35 = vadd.f32 %v2867_v4, %v1931_v16 }
 0x138   : > { %v2818_v55 = vadd.f32 %v2817_v33, %v2816_v41  ;;  %v2819_v46 = vpop.f32.mrb[30].mxu0 }
 0x139   : > { %v2868_v36 = vpop.f32.mrb[28].mxu1  ;;  %v2820_v61 = vpop.f32.mrb[31].mxu0 }
 0x13a   : > { %v1936_v51 = vadd.f32 %v2818_v55, %v3991_v5  ;;  %v2821_v44 = vadd.f32 %v2820_v61, %v2819_v46  ;;  %v2869_v47 = vpop.f32.mrb[29].mxu1 }
 0x13b   : > { %v2870_v22 = vadd.f32 %v2869_v47, %v2868_v36  ;;  %v2871_v63 = vpop.f32.mrb[30].mxu1 }
 0x13c   : > { %v1939_v50 = vadd.f32 %v2821_v44, %v3993_v12  ;;  %v2872_v40 = vpop.f32.mrb[31].mxu1  ;;  %v2199_v44 = vlaneseq }
 0x13d   : > { %v2873_v53 = vadd.f32 %v2872_v40, %v2871_v63  ;;  %v4027_v60 = vadd.f32 %v2870_v22, %v1936_v51 }
 0x13f   : > { %v4029_v49 = vadd.f32 %v2873_v53, %v1939_v50 }
 0x140   : > { %v2822_v30 = vpop.f32.mrb[32].mxu0 }
 0x141   : > { %v2874_v26 = vpop.f32.mrb[32].mxu1  ;;  %v2823_v48 = vpop.f32.mrb[33].mxu0 }
 0x142   : > { %v2875_v9 = vpop.f32.mrb[33].mxu1  ;;  %v2824_v56 = vadd.f32 %v2823_v48, %v2822_v30  ;;  %v2825_v27 = vpop.f32.mrb[34].mxu0 }
 0x143   : > { %v2876_v42 = vadd.f32 %v2875_v9, %v2874_v26  ;;  %v2877_v5 = vpop.f32.mrb[34].mxu1  ;;  %v2826_v1 = vpop.f32.mrb[35].mxu0 }
 0x144   : > { %v2878_v20 = vpop.f32.mrb[35].mxu1  ;;  %v1944_v39 = vadd.f32 %v2824_v56, %v3996_v29  ;;  %v2827_v17 = vadd.f32 %v2826_v1, %v2825_v27 }
 0x145   : > { %v2879_v12 = vadd.f32 %v2878_v20, %v2877_v5 }
 0x146   : > { %v1947_v32 = vadd.f32 %v2827_v17, %v3999_v2  ;;  %v4033_v25 = vadd.f32 %v2876_v42, %v1944_v39  ;;  %v4052_v42 = vstv %s2640_s12 }
 0x148   : > { %v4035_v15 = vadd.f32 %v2879_v12, %v1947_v32 }
 0x149   : > { %v2880_v28 = vpop.f32.mrb[36].mxu1  ;;  %v2828_v59 = vpop.f32.mrb[36].mxu0 }
 0x14a   : > { %v2881_v0 = vpop.f32.mrb[37].mxu1  ;;  %v2829_v58 = vpop.f32.mrb[37].mxu0 }
 0x14b   : > { %v2882_v14 = vadd.f32 %v2881_v0, %v2880_v28  ;;  %v2883_v24 = vpop.f32.mrb[38].mxu1  ;;  %v2830_v54 = vadd.f32 %v2829_v58, %v2828_v59  ;;  %v2831_v37 = vpop.f32.mrb[38].mxu0 }
 0x14c   : > { %v2884_v34 = vpop.f32.mrb[39].mxu1  ;;  %v2832_v45 = vpop.f32.mrb[39].mxu0 }
 0x14d   : > { %v2885_v10 = vadd.f32 %v2884_v34, %v2883_v24  ;;  %v1952_v29 = vadd.f32 %v2830_v54, %v4007_v52  ;;  %v2833_v6 = vadd.f32 %v2832_v45, %v2831_v37 }
 0x14f   : > { %v1955_v2 = vadd.f32 %v2833_v6, %v4009_v57  ;;  %v2033_v11 = vadd.f32 %v2882_v14, %v1952_v29 }
 0x151   : > { %v2886_v13 = vpop.f32.mrb[40].mxu1  ;;  %v2834_v23 = vpop.f32.mrb[40].mxu0  ;;  %v2036_v16 = vadd.f32 %v2885_v10, %v1955_v2 }
 0x152   : > { %v2887_v31 = vpop.f32.mrb[41].mxu1  ;;  %v2835_v62 = vpop.f32.mrb[41].mxu0 }
 0x153   : > { %v2888_v18 = vadd.f32 %v2887_v31, %v2886_v13  ;;  %v2889_v19 = vpop.f32.mrb[42].mxu1  ;;  %v2836_v38 = vadd.f32 %v2835_v62, %v2834_v23  ;;  %v2837_v4 = vpop.f32.mrb[42].mxu0 }
 0x154   : > { %v2890_v41 = vpop.f32.mrb[43].mxu1  ;;  %v2838_v33 = vpop.f32.mrb[43].mxu0 }
 0x155   : > { %v2891_v55 = vadd.f32 %v2890_v41, %v2889_v19  ;;  %v1960_v52 = vadd.f32 %v2836_v38, %v4011_v21  ;;  %v2839_v46 = vadd.f32 %v2838_v33, %v2837_v4 }
 0x157   : > { %v1963_v57 = vadd.f32 %v2839_v46, %v4013_v7  ;;  %v4042_v36 = vadd.f32 %v2888_v18, %v1960_v52  ;;  %v4048_v7 = vshrl.u32 %v2199_v44, 7 }
 0x159   : > { %v2892_v61 = vpop.f32.mrb[44].mxu1  ;;  %v4045_v47 = vadd.f32 %v2891_v55, %v1963_v57  ;;  %v2840_v22 = vpop.f32.mrb[44].mxu0  ;;  %v2202_v20 = vadd.s32 16, %v4048_v7  ;;  %v2201_v12 = vadd.s32 8, %v4048_v7  ;;  %vm2213_vm6 = vcmp.lt.s32.totalorder %v4048_v7, %v4052_v42 }
 0x15a   : > { %v2893_v51 = vpop.f32.mrb[45].mxu1  ;;  %v2841_v40 = vpop.f32.mrb[45].mxu0  ;;  %v2203_v24 = vadd.s32 24, %v4048_v7  ;;  %v2205_v6 = vadd.s32 40, %v4048_v7  ;;  %v2206_v2 = vadd.s32 48, %v4048_v7  ;;  %v2207_v4 = vadd.s32 56, %v4048_v7 }
 0x15b   : > { %v2894_v63 = vadd.f32 %v2893_v51, %v2892_v61  ;;  %v2895_v50 = vpop.f32.mrb[46].mxu1  ;;  %v2842_v21 = vadd.f32 %v2841_v40, %v2840_v22  ;;  %v2843_v30 = vpop.f32.mrb[46].mxu0  ;;  %vm2215_vm7 = vcmp.lt.s32.totalorder %v2202_v20, %v4052_v42  ;;  %vm2214_vm8 = vcmp.lt.s32.totalorder %v2201_v12, %v4052_v42 }
 0x15c   : > { %v2896_v53 = vpop.f32.mrb[47].mxu1  ;;  %v2844_v48 = vpop.f32.mrb[47].mxu0  ;;  %vm2216_vm10 = vcmp.lt.s32.totalorder %v2203_v24, %v4052_v42  ;;  %vm2218_vm11 = vcmp.lt.s32.totalorder %v2205_v6, %v4052_v42  ;;  %vm2219_vm12 = vcmp.lt.s32.totalorder %v2206_v2, %v4052_v42  ;;  %v2208_v44 = vadd.s32 64, %v4048_v7 }
 0x15d   : > { %v2897_v26 = vadd.f32 %v2896_v53, %v2895_v50  ;;  %v1968_v9 = vadd.f32 %v2842_v21, %v4015_v8  ;;  %v2845_v56 = vadd.f32 %v2844_v48, %v2843_v30  ;;  %v2204_v8 = vadd.s32 32, %v4048_v7 }
 0x15e   : > { %vm2220_vm13 = vcmp.lt.s32.totalorder %v2207_v4, %v4052_v42  ;;  %vm2221_vm14 = vcmp.lt.s32.totalorder %v2208_v44, %v4052_v42 }
 0x15f   : > { %v1971_v27 = vadd.f32 %v2845_v56, %v4017_v3  ;;  %v2049_v1 = vadd.f32 %v2894_v63, %v1968_v9  ;;  %vm2217_vm9 = vcmp.lt.s32.totalorder %v2204_v8, %v4052_v42  ;;  %v2209_v9 = vadd.s32 72, %v4048_v7 }
 0x160   : > { %v2210_v56 = vadd.s32 80, %v4048_v7 }
 0x161   : > { %v2934_v5 = vpop.f32.mrb[48].mxu1  ;;  %v2930_v32 = vpop.f32.mrb[48].mxu0  ;;  %v2052_v59 = vadd.f32 %v2897_v26, %v1971_v27  ;;  %vm2222_vm15 = vcmp.lt.s32.totalorder %v2209_v9, %v4052_v42 }
 0x162   : > { %v4055_v39 = vadd.f32 %v2934_v5, %v2033_v11  ;;  %v2105_v17 = vpop.f32.mrb[49].mxu1  ;;  %v2098_v3 = vadd.f32 %v2930_v32, %v4027_v60  ;;  %v2089_v14 = vpop.f32.mrb[49].mxu0  ;;  %vm2223_vm0 = vcmp.lt.s32.totalorder %v2210_v56, %v4052_v42 }
 0x163   : > { %v2106_v28 = vadd.f32 %v2105_v17, %v4033_v25  ;;  %v2935_v0 = vpop.f32.mrb[50].mxu1  ;;  %v2090_v54 = vadd.f32 %v2089_v14, %v4021_v43  ;;  %v2931_v25 = vpop.f32.mrb[50].mxu0  ;;  %v2211_v17 = vadd.s32 88, %v4048_v7 }
 0x164   : > { %v4064_v58 = vadd.f32 %v2935_v0, %v2036_v16  ;;  %v2108_v34 = vpop.f32.mrb[51].mxu1  ;;  %v2101_v37 = vadd.f32 %v2931_v25, %v4029_v49  ;;  %v2092_v45 = vpop.f32.mrb[51].mxu0  ;;  %v2227_v49 = vsel %vm2215_vm7, %v2098_v3, 0.0 }
 0x165   : > { %v2109_v60 = vadd.f32 %v2108_v34, %v4035_v15  ;;  %v2225_v43 = vsel %vm2213_vm6, %v2090_v54, 0.0  ;;  %v2093_v29 = vadd.f32 %v2092_v45, %v4023_v35  ;;  %v2257_v55 = vmul.f32 %v2227_v49, %v2227_v49 }
 0x166   : > { %v2673_v10 = vpack.c.bf16 %v4064_v58, %v4055_v39  ;;  %v2663_v15 = vpack.c.bf16 %v2101_v37, %v2098_v3  ;;  %v2255_v16 = vmul.f32 %v2225_v43, %v2225_v43  ;;  %v2228_v38 = vsel %vm2216_vm10, %v2101_v37, 0.0 }
 0x167   : > { %v2658_v11 = vpack.c.bf16 %v2093_v29, %v2090_v54  ;;  %v2226_v13 = vsel %vm2214_vm8, %v2093_v29, 0.0  ;;  %v2668_v23 = vpack.c.bf16 %v2109_v60, %v2106_v28  ;;  %v2229_v51 = vsel %vm2217_vm9, %v2106_v28, 0.0 }
 0x168   : > { %2687 = vst [vmem:[%s4070_s7 + $0x18] sm:$0xff] %v2673_v10   ;;  %2685 = vst [vmem:[%s4070_s7 + $0x8] sm:$0xff] %v2663_v15   ;;  %v2237_v35 = vadd.f32 %v2226_v13, %v2225_v43  ;;  %v2256_v62 = vmul.f32 %v2226_v13, %v2226_v13  ;;  %v2258_v63 = vmul.f32 %v2228_v38, %v2228_v38  ;;  %v2230_v53 = vsel %vm2218_vm11, %v2109_v60, 0.0 }
 0x169   : > { %v2938_v31 = vpop.f32.mrb[52].mxu1  ;;  %2659 = vst [vmem:[%s4070_s7] sm:$0xff] %v2658_v11   ;;  %2686 = vst [vmem:[%s4070_s7 + $0x10] sm:$0xff] %v2668_v23   ;;  %v2259_v30 = vmul.f32 %v2229_v51, %v2229_v51  ;;  %v2260_v5 = vmul.f32 %v2230_v53, %v2230_v53  ;;  %v2232_v20 = vsel %vm2220_vm13, %v4064_v58, 0.0  ;;  %vm2224_vm1 = vcmp.lt.s32.totalorder %v2211_v17, %v4052_v42 }
 0x16a   : > { %v2130_v18 = vadd.f32 %v2938_v31, %v2049_v1  ;;  %v2121_v19 = vpop.f32.mrb[53].mxu1  ;;  %v2238_v52 = vadd.f32 %v2237_v35, %v2227_v49  ;;  %v2267_v46 = vadd.f32 %v2256_v62, %v2255_v16  ;;  %v2262_v0 = vmul.f32 %v2232_v20, %v2232_v20 }
 0x16b   : > { %v2122_v41 = vadd.f32 %v2121_v19, %v4042_v36  ;;  %v2939_v33 = vpop.f32.mrb[54].mxu1 }
 0x16c   : > { %v2133_v57 = vadd.f32 %v2939_v33, %v2052_v59  ;;  %v2124_v61 = vpop.f32.mrb[55].mxu1  ;;  %v2268_v50 = vadd.f32 %v2267_v46, %v2257_v55  ;;  %v2239_v36 = vadd.f32 %v2238_v52, %v2228_v38  ;;  %v2235_v58 = vsel %vm2223_vm0, %v2130_v18, 0.0 }
 0x16d   : > { %v2125_v22 = vadd.f32 %v2124_v61, %v4045_v47  ;;  %v2231_v47 = vsel %vm2219_vm12, %v4055_v39, 0.0  ;;  %v2233_v8 = vsel %vm2221_vm14, %v2122_v41, 0.0  ;;  %v2265_v37 = vmul.f32 %v2235_v58, %v2235_v58 }
 0x16e   : > { %v2683_v40 = vpack.c.bf16 %v2133_v57, %v2130_v18  ;;  %v2240_v26 = vadd.f32 %v2239_v36, %v2229_v51  ;;  %v2269_v48 = vadd.f32 %v2268_v50, %v2258_v63  ;;  %v2261_v12 = vmul.f32 %v2231_v47, %v2231_v47 }
 0x16f   : > { %v2678_v21 = vpack.c.bf16 %v2125_v22, %v2122_v41  ;;  %v2234_v3 = vsel %vm2222_vm15, %v2125_v22, 0.0  ;;  %v2263_v24 = vmul.f32 %v2233_v8, %v2233_v8  ;;  %v2236_v60 = vsel %vm2224_vm1, %v2133_v57, 0.0 }
 0x170   : > { %2689 = vst [vmem:[%s4070_s7 + $0x28] sm:$0xff] %v2683_v40   ;;  %v2241_v27 = vadd.f32 %v2240_v26, %v2230_v53  ;;  %v2270_v1 = vadd.f32 %v2269_v48, %v2259_v30  ;;  %v2264_v25 = vmul.f32 %v2234_v3, %v2234_v3  ;;  %v2266_v43 = vmul.f32 %v2236_v60, %v2236_v60 }
 0x171   : > { %2688 = vst [vmem:[%s4070_s7 + $0x20] sm:$0xff] %v2678_v21  }
 0x172   : > { %v2242_v32 = vadd.f32 %v2241_v27, %v2231_v47  ;;  %v2271_v28 = vadd.f32 %v2270_v1, %v2260_v5 }
 0x174   : > { %v2272_v39 = vadd.f32 %v2271_v28, %v2261_v12  ;;  %v2243_v59 = vadd.f32 %v2242_v32, %v2232_v20 }
 0x176   : > { %v2244_v14 = vadd.f32 %v2243_v59, %v2233_v8  ;;  %v2273_v34 = vadd.f32 %v2272_v39, %v2262_v0 }
 0x178   : > { %v2274_v54 = vadd.f32 %v2273_v34, %v2263_v24  ;;  %v2245_v7 = vadd.f32 %v2244_v14, %v2234_v3 }
 0x17a   : > { %v2246_v10 = vadd.f32 %v2245_v7, %v2235_v58  ;;  %v2275_v45 = vadd.f32 %v2274_v54, %v2264_v25 }
 0x17c   : > { %v2247_v29 = vadd.f32 %v2246_v10, %v2236_v60  ;;  %v2276_v6 = vadd.f32 %v2275_v45, %v2265_v37 }
 0x17e   : > { %v2248_v2 = vrot.slane %v2247_v29, 4  ;;  %v2277_v15 = vadd.f32 %v2276_v6, %v2266_v43 }
 0x180   : > { %v2249_v49 = vadd.f32 %v2248_v2, %v2247_v29  ;;  %v2278_v11 = vrot.slane %v2277_v15, 4 }
 0x182   : > { %v2250_v13 = vrot.slane %v2249_v49, 2  ;;  %v2279_v23 = vadd.f32 %v2278_v11, %v2277_v15 }
 0x184   : > { %v2251_v42 = vadd.f32 %v2250_v13, %v2249_v49  ;;  %v2280_v31 = vrot.slane %v2279_v23, 2 }
 0x186   : > { %v2252_v16 = vrot.slane %v2251_v42, 1  ;;  %v2281_v35 = vadd.f32 %v2280_v31, %v2279_v23 }
 0x188   : > { %v2253_v62 = vadd.f32 %v2252_v16, %v2251_v42  ;;  %v2282_v18 = vrot.slane %v2281_v35, 1 }
 0x18a   : > { %2254 = vst [vmem:[%s4004_s25] sm:$0x1] %v2253_v62  ;;  %v2283_v19 = vadd.f32 %v2282_v18, %v2281_v35 }
 0x18c   : > { %2284 = vst [vmem:[%s4004_s25 + $0x1] sm:$0x1] %v2283_v19 }
 0x18d PF: > { %s14_s16 = sadd.s32 1, %s3130_s16   ;;  %s4136_s12 = smov %s3122_s14 }
 0x18e   : > { %p11_p7 = scmp.ge.s32.totalorder %s14_s16, 8   ;;  %s4137_s13 = smov %s3126_s15 }
 0x18f   : > { %s4138_s14 = smov %s4141_s17  ;;  %s4139_s15 = smov %s4145_s18 }
 0x190   :  { %13 = sbr.rel (!%p11_p7) target bundleno = 3 (0x3), region = 72 }

</bundles_post_ra>
